<compile_context>
chip_gen: v6e
topology: v6e:2x2x1
jax: 0.10.0
libtpu: 0.0.40
codegen_flags: <defaults>
</compile_context>

<pallas_src>
import functools

import jax
import jax.numpy as jnp
import numpy as np
from jax.experimental import pallas as pl
from jax.experimental.pallas import tpu as pltpu


def _round_up(v, m):
    return -(-v // m) * m


def _choose_row_block(H, row_bytes, budget_bytes, batch):
    """Rows per block: as many as fit the per-copy VMEM budget (multiple of 8, or full H)."""
    th = min(H, max(1, budget_bytes // max(row_bytes, 1)))
    if th < H:
        th = min(H, max(8, (th // 8) * 8))
        # Prefer a divisor of H so no remainder (masked) blocks are generated.
        t = th
        while t > 8 and H % t:
            t -= 8
        if t >= 8 and H % t == 0:
            th = t
    # Keep >= 2 grid blocks so both TensorCores of a v7x chip get work.
    if batch * pl.cdiv(H, th) < 2 and th >= 16:
        th = max(8, ((th // 2) // 8) * 8)
    return th


def _fused_upsample_kernel(w_ref, b_ref, p_ref, x_ref, o_ref, *, c_small, s):
    """Fused PixelShuffle(s) + 1x1 Conv for one (batch, row-block) tile.

    x_ref: (C, TH, W)            input rows, C = c_small * s^2, lanes = W.
    p_ref: (s*W, s*W)            constant 0/1 lane-interleave (perfect-shuffle) matrix.
    o_ref: (c_small, TH, s*s*W)  grouped output rows:
           o_ref[o, h, sh*(s*W) + w*s + sw] == out[n, o, h*s+sh, w*s+sw]
           (a free row-major view of the final (N, c_small, H*s, W*s) tensor).
    w_ref: (c_small*c_small,) f32 SMEM, row-major [o, ci].   b_ref: (c_small,) f32 SMEM.
    """
    s2 = s * s
    x = x_ref[...]          # one load of the whole input tile
    p = p_ref[...]          # interleave matrix (resident across grid steps)

    outs = []
    for o in range(c_small):
        rows = []
        for sh in range(s):
            accs = []
            for sw in range(s):
                k = sh * s + sw
                # Tiny channel mix on the VPU (MXU would be >97% padding here).
                a = w_ref[o * c_small] * x[k]
                for ci in range(1, c_small):
                    a = a + w_ref[o * c_small + ci] * x[ci * s2 + k]
                accs.append(a)                                   # (TH, W)
            # Lane interleave of the s sub-pixel columns: [a0 b0 a1 b1 ...].
            # Exact 0/1 permutation matmul on the otherwise-idle MXU.
            stacked = jnp.concatenate(accs, axis=-1)             # (TH, s*W)
            rows.append(jnp.dot(stacked, p, preferred_element_type=jnp.float32))
        # The s row-phases occupy contiguous lane ranges of the grouped layout,
        # so the sub-line (sh) interleave is a plain lane concatenation.
        outs.append(jnp.concatenate(rows, axis=-1) + b_ref[o])   # (TH, s*s*W)

    # Single full-tile, lane-dense store.
    o_ref[...] = jnp.stack(outs, axis=0).astype(o_ref.dtype)


def upsample_forward(x, weight, bias, scale, *, block_budget_bytes=8 * 1024 * 1024):
    """Full Upsample.forward: PixelShuffle(scale) then 1x1 Conv2d.

    x: (N, C, H, W) NCHW. weight: (C//s^2, C//s^2) 1x1-conv matrix. bias: (C//s^2,).
    Returns (N, C//s^2, H*s, W*s).
    """
    N, C, H, W = x.shape
    s = int(scale)
    s2 = s * s
    c_small = C // s2
    assert c_small * s2 == C, "in_channels must be divisible by scale^2"
    assert weight.shape == (c_small, c_small)
    assert bias.shape == (c_small,)

    sW = s * W
    itemsize = jnp.dtype(x.dtype).itemsize

    # VMEM budgeting with lane padding (lanes pad to multiples of 128).
    lane_in = _round_up(W, 128)
    lane_out = _round_up(s2 * W, 128)
    row_bytes = (C * lane_in + c_small * lane_out) * itemsize        # in-row + out-row per h
    p_bytes = sW * sW * 4
    budget = max(1 * 1024 * 1024, block_budget_bytes - 2 * p_bytes)  # leave room for P buffers
    th = _choose_row_block(H, row_bytes, budget, N)

    # Constant perfect-shuffle matrix:  (stacked[:, sw*W + w]) @ P -> row[:, w*s + sw].
    i_idx = np.arange(sW)[:, None]
    l_idx = np.arange(sW)[None, :]
    P = jnp.asarray(((i_idx // W == l_idx % s) & (i_idx % W == l_idx // s)).astype(np.float32))

    w_flat = weight.reshape(-1).astype(jnp.float32)   # 1D -> tiny SMEM footprint
    b_flat = bias.astype(jnp.float32)

    kernel = functools.partial(_fused_upsample_kernel, c_small=c_small, s=s)
    grid = (N, pl.cdiv(H, th))

    z = pl.pallas_call(
        kernel,
        out_shape=jax.ShapeDtypeStruct((N, c_small, H, s2 * W), x.dtype),
        grid_spec=pltpu.PrefetchScalarGridSpec(
            num_scalar_prefetch=0,
            grid=grid,
            in_specs=[
                pl.BlockSpec(memory_space=pltpu.MemorySpace.SMEM),          # weight (resident)
                pl.BlockSpec(memory_space=pltpu.MemorySpace.SMEM),          # bias   (resident)
                pl.BlockSpec((sW, sW), lambda n, j: (0, 0)),                # interleave matrix
                pl.BlockSpec((None, C, th, W), lambda n, j: (n, 0, j, 0)),  # input rows
            ],
            out_specs=pl.BlockSpec((None, c_small, th, s2 * W),
                                   lambda n, j: (n, 0, j, 0)),
        ),
        compiler_params=pltpu.CompilerParams(
            dimension_semantics=("parallel", "parallel"),
            vmem_limit_bytes=48 * 1024 * 1024,   # blocks budgeted ~well below 64 MiB v7x VMEM
        ),
    )(w_flat, b_flat, P, x)

    # (N, C_out, H, s*s*W) -> (N, C_out, H*s, W*s) is a pure row-major view (no data movement).
    return z.reshape(N, c_small, H * s, W * s)


def pixel_shuffle(x, scale):
    """PyTorch nn.PixelShuffle semantics. x: (N, C, H, W) -> (N, C/s^2, H*s, W*s)."""
    N, C, H, W = x.shape
    s = scale
    C_out = C // (s * s)
    x = x.reshape(N, C_out, s, s, H, W)
    x = jnp.transpose(x, (0, 1, 4, 2, 5, 3))
    return x.reshape(N, C_out, H * s, W * s)


def reference_forward(x, weight, bias, scale):
    """Pure-JAX reference (no Pallas) for verification."""
    y = pixel_shuffle(x, scale)
    return jnp.einsum("oc,nchw->nohw", weight, y) + bias[None, :, None, None]


if __name__ == "__main__":
    key = jax.random.PRNGKey(0)
    k_x, k_w, k_b = jax.random.split(key, 3)

    # in_channels=16, scale=2 -> PixelShuffle output / conv channels = 4
    N, C, H, W = 2, 16, 16, 16
    scale = 2
    c_small = C // (scale * scale)

    x = jax.random.normal(k_x, (N, C, H, W), dtype=jnp.float32)

    # Deterministic synthetic 1x1-conv parameters ((C_out, C_in, 1, 1) collapses to (C_out, C_in)).
    fan_in = c_small
    bound = 1.0 / (fan_in ** 0.5)
    weight = jax.random.uniform(k_w, (c_small, c_small), minval=-bound, maxval=bound,
                                dtype=jnp.float32)
    bias = jax.random.uniform(k_b, (c_small,), minval=-bound, maxval=bound,
                              dtype=jnp.float32)

    out = upsample_forward(x, weight, bias, scale)
    out = jax.block_until_ready(out)

    ref = reference_forward(x, weight, bias, scale)
    assert out.shape == (N, c_small, H * scale, W * scale), out.shape
    assert jnp.allclose(out, ref, atol=1e-5, rtol=1e-5), "mismatch vs reference"

    print("KERNEL_OK")
</pallas_src>

<mosaic_0001>
module attributes {stable_mosaic.version = 11 : i64} {
  func.func @_fused_upsample_kernel(%arg0: i32, %arg1: i32, %arg2: memref<16xf32, #tpu.memory_space<smem>>, %arg3: memref<4xf32, #tpu.memory_space<smem>>, %arg4: memref<32x32xf32, #tpu.memory_space<vmem>>, %arg5: memref<1x16x16x16xf32, #tpu.memory_space<vmem>>, %arg6: memref<1x4x16x64xf32, #tpu.memory_space<vmem>>) attributes {dimension_semantics = [#tpu.dimension_semantics<parallel>, #tpu.dimension_semantics<parallel>], iteration_bounds = array<i64: 2, 1>, scalar_prefetch = 0 : i64, scratch_operands = 0 : i64, tpu.core_type = #tpu.core_type<tc>, window_params = [{transform_indices = @transform_0, window_bounds = array<i64: 16>}, {transform_indices = @transform_1, window_bounds = array<i64: 4>}, {pipeline_mode = #tpu.pipeline_mode<synchronous>, transform_indices = @transform_2, window_bounds = array<i64: 32, 32>}, {transform_indices = @transform_3, window_bounds = array<i64: 1, 16, 16, 16>}, {transform_indices = @transform_4, window_bounds = array<i64: 1, 4, 16, 64>}]} {
    %c0 = arith.constant 0 : index
    %c0_0 = arith.constant 0 : index
    %c0_1 = arith.constant 0 : index
    %c0_2 = arith.constant 0 : index
    %0 = vector.load %arg5[%c0, %c0_0, %c0_1, %c0_2] : memref<1x16x16x16xf32, #tpu.memory_space<vmem>>, vector<1x16x16x16xf32>
    %1 = vector.shape_cast %0 : vector<1x16x16x16xf32> to vector<16x16x16xf32>
    %c0_3 = arith.constant 0 : index
    %c0_4 = arith.constant 0 : index
    %2 = vector.load %arg4[%c0_3, %c0_4] : memref<32x32xf32, #tpu.memory_space<vmem>>, vector<32x32xf32>
    %c0_5 = arith.constant 0 : index
    %3 = memref.load %arg2[%c0_5] : memref<16xf32, #tpu.memory_space<smem>>
    %4 = vector.extract_strided_slice %1 {offsets = [0, 0, 0], sizes = [1, 16, 16], strides = [1, 1, 1]} : vector<16x16x16xf32> to vector<1x16x16xf32>
    %5 = vector.shape_cast %4 : vector<1x16x16xf32> to vector<16x16xf32>
    %6 = vector.broadcast %3 : f32 to vector<16x16xf32>
    %7 = arith.mulf %6, %5 : vector<16x16xf32>
    %c1 = arith.constant 1 : index
    %8 = memref.load %arg2[%c1] : memref<16xf32, #tpu.memory_space<smem>>
    %9 = vector.extract_strided_slice %1 {offsets = [4, 0, 0], sizes = [1, 16, 16], strides = [1, 1, 1]} : vector<16x16x16xf32> to vector<1x16x16xf32>
    %10 = vector.shape_cast %9 : vector<1x16x16xf32> to vector<16x16xf32>
    %11 = vector.broadcast %8 : f32 to vector<16x16xf32>
    %12 = arith.mulf %11, %10 : vector<16x16xf32>
    %13 = arith.addf %7, %12 : vector<16x16xf32>
    %c2 = arith.constant 2 : index
    %14 = memref.load %arg2[%c2] : memref<16xf32, #tpu.memory_space<smem>>
    %15 = vector.extract_strided_slice %1 {offsets = [8, 0, 0], sizes = [1, 16, 16], strides = [1, 1, 1]} : vector<16x16x16xf32> to vector<1x16x16xf32>
    %16 = vector.shape_cast %15 : vector<1x16x16xf32> to vector<16x16xf32>
    %17 = vector.broadcast %14 : f32 to vector<16x16xf32>
    %18 = arith.mulf %17, %16 : vector<16x16xf32>
    %19 = arith.addf %13, %18 : vector<16x16xf32>
    %c3 = arith.constant 3 : index
    %20 = memref.load %arg2[%c3] : memref<16xf32, #tpu.memory_space<smem>>
    %21 = vector.extract_strided_slice %1 {offsets = [12, 0, 0], sizes = [1, 16, 16], strides = [1, 1, 1]} : vector<16x16x16xf32> to vector<1x16x16xf32>
    %22 = vector.shape_cast %21 : vector<1x16x16xf32> to vector<16x16xf32>
    %23 = vector.broadcast %20 : f32 to vector<16x16xf32>
    %24 = arith.mulf %23, %22 : vector<16x16xf32>
    %25 = arith.addf %19, %24 : vector<16x16xf32>
    %c0_6 = arith.constant 0 : index
    %26 = memref.load %arg2[%c0_6] : memref<16xf32, #tpu.memory_space<smem>>
    %27 = vector.extract_strided_slice %1 {offsets = [1, 0, 0], sizes = [1, 16, 16], strides = [1, 1, 1]} : vector<16x16x16xf32> to vector<1x16x16xf32>
    %28 = vector.shape_cast %27 : vector<1x16x16xf32> to vector<16x16xf32>
    %29 = vector.broadcast %26 : f32 to vector<16x16xf32>
    %30 = arith.mulf %29, %28 : vector<16x16xf32>
    %c1_7 = arith.constant 1 : index
    %31 = memref.load %arg2[%c1_7] : memref<16xf32, #tpu.memory_space<smem>>
    %32 = vector.extract_strided_slice %1 {offsets = [5, 0, 0], sizes = [1, 16, 16], strides = [1, 1, 1]} : vector<16x16x16xf32> to vector<1x16x16xf32>
    %33 = vector.shape_cast %32 : vector<1x16x16xf32> to vector<16x16xf32>
    %34 = vector.broadcast %31 : f32 to vector<16x16xf32>
    %35 = arith.mulf %34, %33 : vector<16x16xf32>
    %36 = arith.addf %30, %35 : vector<16x16xf32>
    %c2_8 = arith.constant 2 : index
    %37 = memref.load %arg2[%c2_8] : memref<16xf32, #tpu.memory_space<smem>>
    %38 = vector.extract_strided_slice %1 {offsets = [9, 0, 0], sizes = [1, 16, 16], strides = [1, 1, 1]} : vector<16x16x16xf32> to vector<1x16x16xf32>
    %39 = vector.shape_cast %38 : vector<1x16x16xf32> to vector<16x16xf32>
    %40 = vector.broadcast %37 : f32 to vector<16x16xf32>
    %41 = arith.mulf %40, %39 : vector<16x16xf32>
    %42 = arith.addf %36, %41 : vector<16x16xf32>
    %c3_9 = arith.constant 3 : index
    %43 = memref.load %arg2[%c3_9] : memref<16xf32, #tpu.memory_space<smem>>
    %44 = vector.extract_strided_slice %1 {offsets = [13, 0, 0], sizes = [1, 16, 16], strides = [1, 1, 1]} : vector<16x16x16xf32> to vector<1x16x16xf32>
    %45 = vector.shape_cast %44 : vector<1x16x16xf32> to vector<16x16xf32>
    %46 = vector.broadcast %43 : f32 to vector<16x16xf32>
    %47 = arith.mulf %46, %45 : vector<16x16xf32>
    %48 = arith.addf %42, %47 : vector<16x16xf32>
    %49 = tpu.concatenate %25, %48 in 1 : vector<16x16xf32>, vector<16x16xf32> -> vector<16x32xf32>
    %cst = arith.constant dense<0.000000e+00> : vector<16x32xf32>
    %50 = tpu.matmul %49, %2, %cst {dimension_numbers = #tpu.dot_dimension_numbers<[1], [0], [0], [1], [0, 0, 1, 1], [], []>} : vector<16x32xf32>, vector<32x32xf32>, vector<16x32xf32> -> vector<16x32xf32>
    %c0_10 = arith.constant 0 : index
    %51 = memref.load %arg2[%c0_10] : memref<16xf32, #tpu.memory_space<smem>>
    %52 = vector.extract_strided_slice %1 {offsets = [2, 0, 0], sizes = [1, 16, 16], strides = [1, 1, 1]} : vector<16x16x16xf32> to vector<1x16x16xf32>
    %53 = vector.shape_cast %52 : vector<1x16x16xf32> to vector<16x16xf32>
    %54 = vector.broadcast %51 : f32 to vector<16x16xf32>
    %55 = arith.mulf %54, %53 : vector<16x16xf32>
    %c1_11 = arith.constant 1 : index
    %56 = memref.load %arg2[%c1_11] : memref<16xf32, #tpu.memory_space<smem>>
    %57 = vector.extract_strided_slice %1 {offsets = [6, 0, 0], sizes = [1, 16, 16], strides = [1, 1, 1]} : vector<16x16x16xf32> to vector<1x16x16xf32>
    %58 = vector.shape_cast %57 : vector<1x16x16xf32> to vector<16x16xf32>
    %59 = vector.broadcast %56 : f32 to vector<16x16xf32>
    %60 = arith.mulf %59, %58 : vector<16x16xf32>
    %61 = arith.addf %55, %60 : vector<16x16xf32>
    %c2_12 = arith.constant 2 : index
    %62 = memref.load %arg2[%c2_12] : memref<16xf32, #tpu.memory_space<smem>>
    %63 = vector.extract_strided_slice %1 {offsets = [10, 0, 0], sizes = [1, 16, 16], strides = [1, 1, 1]} : vector<16x16x16xf32> to vector<1x16x16xf32>
    %64 = vector.shape_cast %63 : vector<1x16x16xf32> to vector<16x16xf32>
    %65 = vector.broadcast %62 : f32 to vector<16x16xf32>
    %66 = arith.mulf %65, %64 : vector<16x16xf32>
    %67 = arith.addf %61, %66 : vector<16x16xf32>
    %c3_13 = arith.constant 3 : index
    %68 = memref.load %arg2[%c3_13] : memref<16xf32, #tpu.memory_space<smem>>
    %69 = vector.extract_strided_slice %1 {offsets = [14, 0, 0], sizes = [1, 16, 16], strides = [1, 1, 1]} : vector<16x16x16xf32> to vector<1x16x16xf32>
    %70 = vector.shape_cast %69 : vector<1x16x16xf32> to vector<16x16xf32>
    %71 = vector.broadcast %68 : f32 to vector<16x16xf32>
    %72 = arith.mulf %71, %70 : vector<16x16xf32>
    %73 = arith.addf %67, %72 : vector<16x16xf32>
    %c0_14 = arith.constant 0 : index
    %74 = memref.load %arg2[%c0_14] : memref<16xf32, #tpu.memory_space<smem>>
    %75 = vector.extract_strided_slice %1 {offsets = [3, 0, 0], sizes = [1, 16, 16], strides = [1, 1, 1]} : vector<16x16x16xf32> to vector<1x16x16xf32>
    %76 = vector.shape_cast %75 : vector<1x16x16xf32> to vector<16x16xf32>
    %77 = vector.broadcast %74 : f32 to vector<16x16xf32>
    %78 = arith.mulf %77, %76 : vector<16x16xf32>
    %c1_15 = arith.constant 1 : index
    %79 = memref.load %arg2[%c1_15] : memref<16xf32, #tpu.memory_space<smem>>
    %80 = vector.extract_strided_slice %1 {offsets = [7, 0, 0], sizes = [1, 16, 16], strides = [1, 1, 1]} : vector<16x16x16xf32> to vector<1x16x16xf32>
    %81 = vector.shape_cast %80 : vector<1x16x16xf32> to vector<16x16xf32>
    %82 = vector.broadcast %79 : f32 to vector<16x16xf32>
    %83 = arith.mulf %82, %81 : vector<16x16xf32>
    %84 = arith.addf %78, %83 : vector<16x16xf32>
    %c2_16 = arith.constant 2 : index
    %85 = memref.load %arg2[%c2_16] : memref<16xf32, #tpu.memory_space<smem>>
    %86 = vector.extract_strided_slice %1 {offsets = [11, 0, 0], sizes = [1, 16, 16], strides = [1, 1, 1]} : vector<16x16x16xf32> to vector<1x16x16xf32>
    %87 = vector.shape_cast %86 : vector<1x16x16xf32> to vector<16x16xf32>
    %88 = vector.broadcast %85 : f32 to vector<16x16xf32>
    %89 = arith.mulf %88, %87 : vector<16x16xf32>
    %90 = arith.addf %84, %89 : vector<16x16xf32>
    %c3_17 = arith.constant 3 : index
    %91 = memref.load %arg2[%c3_17] : memref<16xf32, #tpu.memory_space<smem>>
    %92 = vector.extract_strided_slice %1 {offsets = [15, 0, 0], sizes = [1, 16, 16], strides = [1, 1, 1]} : vector<16x16x16xf32> to vector<1x16x16xf32>
    %93 = vector.shape_cast %92 : vector<1x16x16xf32> to vector<16x16xf32>
    %94 = vector.broadcast %91 : f32 to vector<16x16xf32>
    %95 = arith.mulf %94, %93 : vector<16x16xf32>
    %96 = arith.addf %90, %95 : vector<16x16xf32>
    %97 = tpu.concatenate %73, %96 in 1 : vector<16x16xf32>, vector<16x16xf32> -> vector<16x32xf32>
    %cst_18 = arith.constant dense<0.000000e+00> : vector<16x32xf32>
    %98 = tpu.matmul %97, %2, %cst_18 {dimension_numbers = #tpu.dot_dimension_numbers<[1], [0], [0], [1], [0, 0, 1, 1], [], []>} : vector<16x32xf32>, vector<32x32xf32>, vector<16x32xf32> -> vector<16x32xf32>
    %99 = tpu.concatenate %50, %98 in 1 : vector<16x32xf32>, vector<16x32xf32> -> vector<16x64xf32>
    %c0_19 = arith.constant 0 : index
    %100 = memref.load %arg3[%c0_19] : memref<4xf32, #tpu.memory_space<smem>>
    %101 = vector.broadcast %100 : f32 to vector<16x64xf32>
    %102 = arith.addf %99, %101 : vector<16x64xf32>
    %c4 = arith.constant 4 : index
    %103 = memref.load %arg2[%c4] : memref<16xf32, #tpu.memory_space<smem>>
    %104 = vector.extract_strided_slice %1 {offsets = [0, 0, 0], sizes = [1, 16, 16], strides = [1, 1, 1]} : vector<16x16x16xf32> to vector<1x16x16xf32>
    %105 = vector.shape_cast %104 : vector<1x16x16xf32> to vector<16x16xf32>
    %106 = vector.broadcast %103 : f32 to vector<16x16xf32>
    %107 = arith.mulf %106, %105 : vector<16x16xf32>
    %c5 = arith.constant 5 : index
    %108 = memref.load %arg2[%c5] : memref<16xf32, #tpu.memory_space<smem>>
    %109 = vector.extract_strided_slice %1 {offsets = [4, 0, 0], sizes = [1, 16, 16], strides = [1, 1, 1]} : vector<16x16x16xf32> to vector<1x16x16xf32>
    %110 = vector.shape_cast %109 : vector<1x16x16xf32> to vector<16x16xf32>
    %111 = vector.broadcast %108 : f32 to vector<16x16xf32>
    %112 = arith.mulf %111, %110 : vector<16x16xf32>
    %113 = arith.addf %107, %112 : vector<16x16xf32>
    %c6 = arith.constant 6 : index
    %114 = memref.load %arg2[%c6] : memref<16xf32, #tpu.memory_space<smem>>
    %115 = vector.extract_strided_slice %1 {offsets = [8, 0, 0], sizes = [1, 16, 16], strides = [1, 1, 1]} : vector<16x16x16xf32> to vector<1x16x16xf32>
    %116 = vector.shape_cast %115 : vector<1x16x16xf32> to vector<16x16xf32>
    %117 = vector.broadcast %114 : f32 to vector<16x16xf32>
    %118 = arith.mulf %117, %116 : vector<16x16xf32>
    %119 = arith.addf %113, %118 : vector<16x16xf32>
    %c7 = arith.constant 7 : index
    %120 = memref.load %arg2[%c7] : memref<16xf32, #tpu.memory_space<smem>>
    %121 = vector.extract_strided_slice %1 {offsets = [12, 0, 0], sizes = [1, 16, 16], strides = [1, 1, 1]} : vector<16x16x16xf32> to vector<1x16x16xf32>
    %122 = vector.shape_cast %121 : vector<1x16x16xf32> to vector<16x16xf32>
    %123 = vector.broadcast %120 : f32 to vector<16x16xf32>
    %124 = arith.mulf %123, %122 : vector<16x16xf32>
    %125 = arith.addf %119, %124 : vector<16x16xf32>
    %c4_20 = arith.constant 4 : index
    %126 = memref.load %arg2[%c4_20] : memref<16xf32, #tpu.memory_space<smem>>
    %127 = vector.extract_strided_slice %1 {offsets = [1, 0, 0], sizes = [1, 16, 16], strides = [1, 1, 1]} : vector<16x16x16xf32> to vector<1x16x16xf32>
    %128 = vector.shape_cast %127 : vector<1x16x16xf32> to vector<16x16xf32>
    %129 = vector.broadcast %126 : f32 to vector<16x16xf32>
    %130 = arith.mulf %129, %128 : vector<16x16xf32>
    %c5_21 = arith.constant 5 : index
    %131 = memref.load %arg2[%c5_21] : memref<16xf32, #tpu.memory_space<smem>>
    %132 = vector.extract_strided_slice %1 {offsets = [5, 0, 0], sizes = [1, 16, 16], strides = [1, 1, 1]} : vector<16x16x16xf32> to vector<1x16x16xf32>
    %133 = vector.shape_cast %132 : vector<1x16x16xf32> to vector<16x16xf32>
    %134 = vector.broadcast %131 : f32 to vector<16x16xf32>
    %135 = arith.mulf %134, %133 : vector<16x16xf32>
    %136 = arith.addf %130, %135 : vector<16x16xf32>
    %c6_22 = arith.constant 6 : index
    %137 = memref.load %arg2[%c6_22] : memref<16xf32, #tpu.memory_space<smem>>
    %138 = vector.extract_strided_slice %1 {offsets = [9, 0, 0], sizes = [1, 16, 16], strides = [1, 1, 1]} : vector<16x16x16xf32> to vector<1x16x16xf32>
    %139 = vector.shape_cast %138 : vector<1x16x16xf32> to vector<16x16xf32>
    %140 = vector.broadcast %137 : f32 to vector<16x16xf32>
    %141 = arith.mulf %140, %139 : vector<16x16xf32>
    %142 = arith.addf %136, %141 : vector<16x16xf32>
    %c7_23 = arith.constant 7 : index
    %143 = memref.load %arg2[%c7_23] : memref<16xf32, #tpu.memory_space<smem>>
    %144 = vector.extract_strided_slice %1 {offsets = [13, 0, 0], sizes = [1, 16, 16], strides = [1, 1, 1]} : vector<16x16x16xf32> to vector<1x16x16xf32>
    %145 = vector.shape_cast %144 : vector<1x16x16xf32> to vector<16x16xf32>
    %146 = vector.broadcast %143 : f32 to vector<16x16xf32>
    %147 = arith.mulf %146, %145 : vector<16x16xf32>
    %148 = arith.addf %142, %147 : vector<16x16xf32>
    %149 = tpu.concatenate %125, %148 in 1 : vector<16x16xf32>, vector<16x16xf32> -> vector<16x32xf32>
    %cst_24 = arith.constant dense<0.000000e+00> : vector<16x32xf32>
    %150 = tpu.matmul %149, %2, %cst_24 {dimension_numbers = #tpu.dot_dimension_numbers<[1], [0], [0], [1], [0, 0, 1, 1], [], []>} : vector<16x32xf32>, vector<32x32xf32>, vector<16x32xf32> -> vector<16x32xf32>
    %c4_25 = arith.constant 4 : index
    %151 = memref.load %arg2[%c4_25] : memref<16xf32, #tpu.memory_space<smem>>
    %152 = vector.extract_strided_slice %1 {offsets = [2, 0, 0], sizes = [1, 16, 16], strides = [1, 1, 1]} : vector<16x16x16xf32> to vector<1x16x16xf32>
    %153 = vector.shape_cast %152 : vector<1x16x16xf32> to vector<16x16xf32>
    %154 = vector.broadcast %151 : f32 to vector<16x16xf32>
    %155 = arith.mulf %154, %153 : vector<16x16xf32>
    %c5_26 = arith.constant 5 : index
    %156 = memref.load %arg2[%c5_26] : memref<16xf32, #tpu.memory_space<smem>>
    %157 = vector.extract_strided_slice %1 {offsets = [6, 0, 0], sizes = [1, 16, 16], strides = [1, 1, 1]} : vector<16x16x16xf32> to vector<1x16x16xf32>
    %158 = vector.shape_cast %157 : vector<1x16x16xf32> to vector<16x16xf32>
    %159 = vector.broadcast %156 : f32 to vector<16x16xf32>
    %160 = arith.mulf %159, %158 : vector<16x16xf32>
    %161 = arith.addf %155, %160 : vector<16x16xf32>
    %c6_27 = arith.constant 6 : index
    %162 = memref.load %arg2[%c6_27] : memref<16xf32, #tpu.memory_space<smem>>
    %163 = vector.extract_strided_slice %1 {offsets = [10, 0, 0], sizes = [1, 16, 16], strides = [1, 1, 1]} : vector<16x16x16xf32> to vector<1x16x16xf32>
    %164 = vector.shape_cast %163 : vector<1x16x16xf32> to vector<16x16xf32>
    %165 = vector.broadcast %162 : f32 to vector<16x16xf32>
    %166 = arith.mulf %165, %164 : vector<16x16xf32>
    %167 = arith.addf %161, %166 : vector<16x16xf32>
    %c7_28 = arith.constant 7 : index
    %168 = memref.load %arg2[%c7_28] : memref<16xf32, #tpu.memory_space<smem>>
    %169 = vector.extract_strided_slice %1 {offsets = [14, 0, 0], sizes = [1, 16, 16], strides = [1, 1, 1]} : vector<16x16x16xf32> to vector<1x16x16xf32>
    %170 = vector.shape_cast %169 : vector<1x16x16xf32> to vector<16x16xf32>
    %171 = vector.broadcast %168 : f32 to vector<16x16xf32>
    %172 = arith.mulf %171, %170 : vector<16x16xf32>
    %173 = arith.addf %167, %172 : vector<16x16xf32>
    %c4_29 = arith.constant 4 : index
    %174 = memref.load %arg2[%c4_29] : memref<16xf32, #tpu.memory_space<smem>>
    %175 = vector.extract_strided_slice %1 {offsets = [3, 0, 0], sizes = [1, 16, 16], strides = [1, 1, 1]} : vector<16x16x16xf32> to vector<1x16x16xf32>
    %176 = vector.shape_cast %175 : vector<1x16x16xf32> to vector<16x16xf32>
    %177 = vector.broadcast %174 : f32 to vector<16x16xf32>
    %178 = arith.mulf %177, %176 : vector<16x16xf32>
    %c5_30 = arith.constant 5 : index
    %179 = memref.load %arg2[%c5_30] : memref<16xf32, #tpu.memory_space<smem>>
    %180 = vector.extract_strided_slice %1 {offsets = [7, 0, 0], sizes = [1, 16, 16], strides = [1, 1, 1]} : vector<16x16x16xf32> to vector<1x16x16xf32>
    %181 = vector.shape_cast %180 : vector<1x16x16xf32> to vector<16x16xf32>
    %182 = vector.broadcast %179 : f32 to vector<16x16xf32>
    %183 = arith.mulf %182, %181 : vector<16x16xf32>
    %184 = arith.addf %178, %183 : vector<16x16xf32>
    %c6_31 = arith.constant 6 : index
    %185 = memref.load %arg2[%c6_31] : memref<16xf32, #tpu.memory_space<smem>>
    %186 = vector.extract_strided_slice %1 {offsets = [11, 0, 0], sizes = [1, 16, 16], strides = [1, 1, 1]} : vector<16x16x16xf32> to vector<1x16x16xf32>
    %187 = vector.shape_cast %186 : vector<1x16x16xf32> to vector<16x16xf32>
    %188 = vector.broadcast %185 : f32 to vector<16x16xf32>
    %189 = arith.mulf %188, %187 : vector<16x16xf32>
    %190 = arith.addf %184, %189 : vector<16x16xf32>
    %c7_32 = arith.constant 7 : index
    %191 = memref.load %arg2[%c7_32] : memref<16xf32, #tpu.memory_space<smem>>
    %192 = vector.extract_strided_slice %1 {offsets = [15, 0, 0], sizes = [1, 16, 16], strides = [1, 1, 1]} : vector<16x16x16xf32> to vector<1x16x16xf32>
    %193 = vector.shape_cast %192 : vector<1x16x16xf32> to vector<16x16xf32>
    %194 = vector.broadcast %191 : f32 to vector<16x16xf32>
    %195 = arith.mulf %194, %193 : vector<16x16xf32>
    %196 = arith.addf %190, %195 : vector<16x16xf32>
    %197 = tpu.concatenate %173, %196 in 1 : vector<16x16xf32>, vector<16x16xf32> -> vector<16x32xf32>
    %cst_33 = arith.constant dense<0.000000e+00> : vector<16x32xf32>
    %198 = tpu.matmul %197, %2, %cst_33 {dimension_numbers = #tpu.dot_dimension_numbers<[1], [0], [0], [1], [0, 0, 1, 1], [], []>} : vector<16x32xf32>, vector<32x32xf32>, vector<16x32xf32> -> vector<16x32xf32>
    %199 = tpu.concatenate %150, %198 in 1 : vector<16x32xf32>, vector<16x32xf32> -> vector<16x64xf32>
    %c1_34 = arith.constant 1 : index
    %200 = memref.load %arg3[%c1_34] : memref<4xf32, #tpu.memory_space<smem>>
    %201 = vector.broadcast %200 : f32 to vector<16x64xf32>
    %202 = arith.addf %199, %201 : vector<16x64xf32>
    %c8 = arith.constant 8 : index
    %203 = memref.load %arg2[%c8] : memref<16xf32, #tpu.memory_space<smem>>
    %204 = vector.extract_strided_slice %1 {offsets = [0, 0, 0], sizes = [1, 16, 16], strides = [1, 1, 1]} : vector<16x16x16xf32> to vector<1x16x16xf32>
    %205 = vector.shape_cast %204 : vector<1x16x16xf32> to vector<16x16xf32>
    %206 = vector.broadcast %203 : f32 to vector<16x16xf32>
    %207 = arith.mulf %206, %205 : vector<16x16xf32>
    %c9 = arith.constant 9 : index
    %208 = memref.load %arg2[%c9] : memref<16xf32, #tpu.memory_space<smem>>
    %209 = vector.extract_strided_slice %1 {offsets = [4, 0, 0], sizes = [1, 16, 16], strides = [1, 1, 1]} : vector<16x16x16xf32> to vector<1x16x16xf32>
    %210 = vector.shape_cast %209 : vector<1x16x16xf32> to vector<16x16xf32>
    %211 = vector.broadcast %208 : f32 to vector<16x16xf32>
    %212 = arith.mulf %211, %210 : vector<16x16xf32>
    %213 = arith.addf %207, %212 : vector<16x16xf32>
    %c10 = arith.constant 10 : index
    %214 = memref.load %arg2[%c10] : memref<16xf32, #tpu.memory_space<smem>>
    %215 = vector.extract_strided_slice %1 {offsets = [8, 0, 0], sizes = [1, 16, 16], strides = [1, 1, 1]} : vector<16x16x16xf32> to vector<1x16x16xf32>
    %216 = vector.shape_cast %215 : vector<1x16x16xf32> to vector<16x16xf32>
    %217 = vector.broadcast %214 : f32 to vector<16x16xf32>
    %218 = arith.mulf %217, %216 : vector<16x16xf32>
    %219 = arith.addf %213, %218 : vector<16x16xf32>
    %c11 = arith.constant 11 : index
    %220 = memref.load %arg2[%c11] : memref<16xf32, #tpu.memory_space<smem>>
    %221 = vector.extract_strided_slice %1 {offsets = [12, 0, 0], sizes = [1, 16, 16], strides = [1, 1, 1]} : vector<16x16x16xf32> to vector<1x16x16xf32>
    %222 = vector.shape_cast %221 : vector<1x16x16xf32> to vector<16x16xf32>
    %223 = vector.broadcast %220 : f32 to vector<16x16xf32>
    %224 = arith.mulf %223, %222 : vector<16x16xf32>
    %225 = arith.addf %219, %224 : vector<16x16xf32>
    %c8_35 = arith.constant 8 : index
    %226 = memref.load %arg2[%c8_35] : memref<16xf32, #tpu.memory_space<smem>>
    %227 = vector.extract_strided_slice %1 {offsets = [1, 0, 0], sizes = [1, 16, 16], strides = [1, 1, 1]} : vector<16x16x16xf32> to vector<1x16x16xf32>
    %228 = vector.shape_cast %227 : vector<1x16x16xf32> to vector<16x16xf32>
    %229 = vector.broadcast %226 : f32 to vector<16x16xf32>
    %230 = arith.mulf %229, %228 : vector<16x16xf32>
    %c9_36 = arith.constant 9 : index
    %231 = memref.load %arg2[%c9_36] : memref<16xf32, #tpu.memory_space<smem>>
    %232 = vector.extract_strided_slice %1 {offsets = [5, 0, 0], sizes = [1, 16, 16], strides = [1, 1, 1]} : vector<16x16x16xf32> to vector<1x16x16xf32>
    %233 = vector.shape_cast %232 : vector<1x16x16xf32> to vector<16x16xf32>
    %234 = vector.broadcast %231 : f32 to vector<16x16xf32>
    %235 = arith.mulf %234, %233 : vector<16x16xf32>
    %236 = arith.addf %230, %235 : vector<16x16xf32>
    %c10_37 = arith.constant 10 : index
    %237 = memref.load %arg2[%c10_37] : memref<16xf32, #tpu.memory_space<smem>>
    %238 = vector.extract_strided_slice %1 {offsets = [9, 0, 0], sizes = [1, 16, 16], strides = [1, 1, 1]} : vector<16x16x16xf32> to vector<1x16x16xf32>
    %239 = vector.shape_cast %238 : vector<1x16x16xf32> to vector<16x16xf32>
    %240 = vector.broadcast %237 : f32 to vector<16x16xf32>
    %241 = arith.mulf %240, %239 : vector<16x16xf32>
    %242 = arith.addf %236, %241 : vector<16x16xf32>
    %c11_38 = arith.constant 11 : index
    %243 = memref.load %arg2[%c11_38] : memref<16xf32, #tpu.memory_space<smem>>
    %244 = vector.extract_strided_slice %1 {offsets = [13, 0, 0], sizes = [1, 16, 16], strides = [1, 1, 1]} : vector<16x16x16xf32> to vector<1x16x16xf32>
    %245 = vector.shape_cast %244 : vector<1x16x16xf32> to vector<16x16xf32>
    %246 = vector.broadcast %243 : f32 to vector<16x16xf32>
    %247 = arith.mulf %246, %245 : vector<16x16xf32>
    %248 = arith.addf %242, %247 : vector<16x16xf32>
    %249 = tpu.concatenate %225, %248 in 1 : vector<16x16xf32>, vector<16x16xf32> -> vector<16x32xf32>
    %cst_39 = arith.constant dense<0.000000e+00> : vector<16x32xf32>
    %250 = tpu.matmul %249, %2, %cst_39 {dimension_numbers = #tpu.dot_dimension_numbers<[1], [0], [0], [1], [0, 0, 1, 1], [], []>} : vector<16x32xf32>, vector<32x32xf32>, vector<16x32xf32> -> vector<16x32xf32>
    %c8_40 = arith.constant 8 : index
    %251 = memref.load %arg2[%c8_40] : memref<16xf32, #tpu.memory_space<smem>>
    %252 = vector.extract_strided_slice %1 {offsets = [2, 0, 0], sizes = [1, 16, 16], strides = [1, 1, 1]} : vector<16x16x16xf32> to vector<1x16x16xf32>
    %253 = vector.shape_cast %252 : vector<1x16x16xf32> to vector<16x16xf32>
    %254 = vector.broadcast %251 : f32 to vector<16x16xf32>
    %255 = arith.mulf %254, %253 : vector<16x16xf32>
    %c9_41 = arith.constant 9 : index
    %256 = memref.load %arg2[%c9_41] : memref<16xf32, #tpu.memory_space<smem>>
    %257 = vector.extract_strided_slice %1 {offsets = [6, 0, 0], sizes = [1, 16, 16], strides = [1, 1, 1]} : vector<16x16x16xf32> to vector<1x16x16xf32>
    %258 = vector.shape_cast %257 : vector<1x16x16xf32> to vector<16x16xf32>
    %259 = vector.broadcast %256 : f32 to vector<16x16xf32>
    %260 = arith.mulf %259, %258 : vector<16x16xf32>
    %261 = arith.addf %255, %260 : vector<16x16xf32>
    %c10_42 = arith.constant 10 : index
    %262 = memref.load %arg2[%c10_42] : memref<16xf32, #tpu.memory_space<smem>>
    %263 = vector.extract_strided_slice %1 {offsets = [10, 0, 0], sizes = [1, 16, 16], strides = [1, 1, 1]} : vector<16x16x16xf32> to vector<1x16x16xf32>
    %264 = vector.shape_cast %263 : vector<1x16x16xf32> to vector<16x16xf32>
    %265 = vector.broadcast %262 : f32 to vector<16x16xf32>
    %266 = arith.mulf %265, %264 : vector<16x16xf32>
    %267 = arith.addf %261, %266 : vector<16x16xf32>
    %c11_43 = arith.constant 11 : index
    %268 = memref.load %arg2[%c11_43] : memref<16xf32, #tpu.memory_space<smem>>
    %269 = vector.extract_strided_slice %1 {offsets = [14, 0, 0], sizes = [1, 16, 16], strides = [1, 1, 1]} : vector<16x16x16xf32> to vector<1x16x16xf32>
    %270 = vector.shape_cast %269 : vector<1x16x16xf32> to vector<16x16xf32>
    %271 = vector.broadcast %268 : f32 to vector<16x16xf32>
    %272 = arith.mulf %271, %270 : vector<16x16xf32>
    %273 = arith.addf %267, %272 : vector<16x16xf32>
    %c8_44 = arith.constant 8 : index
    %274 = memref.load %arg2[%c8_44] : memref<16xf32, #tpu.memory_space<smem>>
    %275 = vector.extract_strided_slice %1 {offsets = [3, 0, 0], sizes = [1, 16, 16], strides = [1, 1, 1]} : vector<16x16x16xf32> to vector<1x16x16xf32>
    %276 = vector.shape_cast %275 : vector<1x16x16xf32> to vector<16x16xf32>
    %277 = vector.broadcast %274 : f32 to vector<16x16xf32>
    %278 = arith.mulf %277, %276 : vector<16x16xf32>
    %c9_45 = arith.constant 9 : index
    %279 = memref.load %arg2[%c9_45] : memref<16xf32, #tpu.memory_space<smem>>
    %280 = vector.extract_strided_slice %1 {offsets = [7, 0, 0], sizes = [1, 16, 16], strides = [1, 1, 1]} : vector<16x16x16xf32> to vector<1x16x16xf32>
    %281 = vector.shape_cast %280 : vector<1x16x16xf32> to vector<16x16xf32>
    %282 = vector.broadcast %279 : f32 to vector<16x16xf32>
    %283 = arith.mulf %282, %281 : vector<16x16xf32>
    %284 = arith.addf %278, %283 : vector<16x16xf32>
    %c10_46 = arith.constant 10 : index
    %285 = memref.load %arg2[%c10_46] : memref<16xf32, #tpu.memory_space<smem>>
    %286 = vector.extract_strided_slice %1 {offsets = [11, 0, 0], sizes = [1, 16, 16], strides = [1, 1, 1]} : vector<16x16x16xf32> to vector<1x16x16xf32>
    %287 = vector.shape_cast %286 : vector<1x16x16xf32> to vector<16x16xf32>
    %288 = vector.broadcast %285 : f32 to vector<16x16xf32>
    %289 = arith.mulf %288, %287 : vector<16x16xf32>
    %290 = arith.addf %284, %289 : vector<16x16xf32>
    %c11_47 = arith.constant 11 : index
    %291 = memref.load %arg2[%c11_47] : memref<16xf32, #tpu.memory_space<smem>>
    %292 = vector.extract_strided_slice %1 {offsets = [15, 0, 0], sizes = [1, 16, 16], strides = [1, 1, 1]} : vector<16x16x16xf32> to vector<1x16x16xf32>
    %293 = vector.shape_cast %292 : vector<1x16x16xf32> to vector<16x16xf32>
    %294 = vector.broadcast %291 : f32 to vector<16x16xf32>
    %295 = arith.mulf %294, %293 : vector<16x16xf32>
    %296 = arith.addf %290, %295 : vector<16x16xf32>
    %297 = tpu.concatenate %273, %296 in 1 : vector<16x16xf32>, vector<16x16xf32> -> vector<16x32xf32>
    %cst_48 = arith.constant dense<0.000000e+00> : vector<16x32xf32>
    %298 = tpu.matmul %297, %2, %cst_48 {dimension_numbers = #tpu.dot_dimension_numbers<[1], [0], [0], [1], [0, 0, 1, 1], [], []>} : vector<16x32xf32>, vector<32x32xf32>, vector<16x32xf32> -> vector<16x32xf32>
    %299 = tpu.concatenate %250, %298 in 1 : vector<16x32xf32>, vector<16x32xf32> -> vector<16x64xf32>
    %c2_49 = arith.constant 2 : index
    %300 = memref.load %arg3[%c2_49] : memref<4xf32, #tpu.memory_space<smem>>
    %301 = vector.broadcast %300 : f32 to vector<16x64xf32>
    %302 = arith.addf %299, %301 : vector<16x64xf32>
    %c12 = arith.constant 12 : index
    %303 = memref.load %arg2[%c12] : memref<16xf32, #tpu.memory_space<smem>>
    %304 = vector.extract_strided_slice %1 {offsets = [0, 0, 0], sizes = [1, 16, 16], strides = [1, 1, 1]} : vector<16x16x16xf32> to vector<1x16x16xf32>
    %305 = vector.shape_cast %304 : vector<1x16x16xf32> to vector<16x16xf32>
    %306 = vector.broadcast %303 : f32 to vector<16x16xf32>
    %307 = arith.mulf %306, %305 : vector<16x16xf32>
    %c13 = arith.constant 13 : index
    %308 = memref.load %arg2[%c13] : memref<16xf32, #tpu.memory_space<smem>>
    %309 = vector.extract_strided_slice %1 {offsets = [4, 0, 0], sizes = [1, 16, 16], strides = [1, 1, 1]} : vector<16x16x16xf32> to vector<1x16x16xf32>
    %310 = vector.shape_cast %309 : vector<1x16x16xf32> to vector<16x16xf32>
    %311 = vector.broadcast %308 : f32 to vector<16x16xf32>
    %312 = arith.mulf %311, %310 : vector<16x16xf32>
    %313 = arith.addf %307, %312 : vector<16x16xf32>
    %c14 = arith.constant 14 : index
    %314 = memref.load %arg2[%c14] : memref<16xf32, #tpu.memory_space<smem>>
    %315 = vector.extract_strided_slice %1 {offsets = [8, 0, 0], sizes = [1, 16, 16], strides = [1, 1, 1]} : vector<16x16x16xf32> to vector<1x16x16xf32>
    %316 = vector.shape_cast %315 : vector<1x16x16xf32> to vector<16x16xf32>
    %317 = vector.broadcast %314 : f32 to vector<16x16xf32>
    %318 = arith.mulf %317, %316 : vector<16x16xf32>
    %319 = arith.addf %313, %318 : vector<16x16xf32>
    %c15 = arith.constant 15 : index
    %320 = memref.load %arg2[%c15] : memref<16xf32, #tpu.memory_space<smem>>
    %321 = vector.extract_strided_slice %1 {offsets = [12, 0, 0], sizes = [1, 16, 16], strides = [1, 1, 1]} : vector<16x16x16xf32> to vector<1x16x16xf32>
    %322 = vector.shape_cast %321 : vector<1x16x16xf32> to vector<16x16xf32>
    %323 = vector.broadcast %320 : f32 to vector<16x16xf32>
    %324 = arith.mulf %323, %322 : vector<16x16xf32>
    %325 = arith.addf %319, %324 : vector<16x16xf32>
    %c12_50 = arith.constant 12 : index
    %326 = memref.load %arg2[%c12_50] : memref<16xf32, #tpu.memory_space<smem>>
    %327 = vector.extract_strided_slice %1 {offsets = [1, 0, 0], sizes = [1, 16, 16], strides = [1, 1, 1]} : vector<16x16x16xf32> to vector<1x16x16xf32>
    %328 = vector.shape_cast %327 : vector<1x16x16xf32> to vector<16x16xf32>
    %329 = vector.broadcast %326 : f32 to vector<16x16xf32>
    %330 = arith.mulf %329, %328 : vector<16x16xf32>
    %c13_51 = arith.constant 13 : index
    %331 = memref.load %arg2[%c13_51] : memref<16xf32, #tpu.memory_space<smem>>
    %332 = vector.extract_strided_slice %1 {offsets = [5, 0, 0], sizes = [1, 16, 16], strides = [1, 1, 1]} : vector<16x16x16xf32> to vector<1x16x16xf32>
    %333 = vector.shape_cast %332 : vector<1x16x16xf32> to vector<16x16xf32>
    %334 = vector.broadcast %331 : f32 to vector<16x16xf32>
    %335 = arith.mulf %334, %333 : vector<16x16xf32>
    %336 = arith.addf %330, %335 : vector<16x16xf32>
    %c14_52 = arith.constant 14 : index
    %337 = memref.load %arg2[%c14_52] : memref<16xf32, #tpu.memory_space<smem>>
    %338 = vector.extract_strided_slice %1 {offsets = [9, 0, 0], sizes = [1, 16, 16], strides = [1, 1, 1]} : vector<16x16x16xf32> to vector<1x16x16xf32>
    %339 = vector.shape_cast %338 : vector<1x16x16xf32> to vector<16x16xf32>
    %340 = vector.broadcast %337 : f32 to vector<16x16xf32>
    %341 = arith.mulf %340, %339 : vector<16x16xf32>
    %342 = arith.addf %336, %341 : vector<16x16xf32>
    %c15_53 = arith.constant 15 : index
    %343 = memref.load %arg2[%c15_53] : memref<16xf32, #tpu.memory_space<smem>>
    %344 = vector.extract_strided_slice %1 {offsets = [13, 0, 0], sizes = [1, 16, 16], strides = [1, 1, 1]} : vector<16x16x16xf32> to vector<1x16x16xf32>
    %345 = vector.shape_cast %344 : vector<1x16x16xf32> to vector<16x16xf32>
    %346 = vector.broadcast %343 : f32 to vector<16x16xf32>
    %347 = arith.mulf %346, %345 : vector<16x16xf32>
    %348 = arith.addf %342, %347 : vector<16x16xf32>
    %349 = tpu.concatenate %325, %348 in 1 : vector<16x16xf32>, vector<16x16xf32> -> vector<16x32xf32>
    %cst_54 = arith.constant dense<0.000000e+00> : vector<16x32xf32>
    %350 = tpu.matmul %349, %2, %cst_54 {dimension_numbers = #tpu.dot_dimension_numbers<[1], [0], [0], [1], [0, 0, 1, 1], [], []>} : vector<16x32xf32>, vector<32x32xf32>, vector<16x32xf32> -> vector<16x32xf32>
    %c12_55 = arith.constant 12 : index
    %351 = memref.load %arg2[%c12_55] : memref<16xf32, #tpu.memory_space<smem>>
    %352 = vector.extract_strided_slice %1 {offsets = [2, 0, 0], sizes = [1, 16, 16], strides = [1, 1, 1]} : vector<16x16x16xf32> to vector<1x16x16xf32>
    %353 = vector.shape_cast %352 : vector<1x16x16xf32> to vector<16x16xf32>
    %354 = vector.broadcast %351 : f32 to vector<16x16xf32>
    %355 = arith.mulf %354, %353 : vector<16x16xf32>
    %c13_56 = arith.constant 13 : index
    %356 = memref.load %arg2[%c13_56] : memref<16xf32, #tpu.memory_space<smem>>
    %357 = vector.extract_strided_slice %1 {offsets = [6, 0, 0], sizes = [1, 16, 16], strides = [1, 1, 1]} : vector<16x16x16xf32> to vector<1x16x16xf32>
    %358 = vector.shape_cast %357 : vector<1x16x16xf32> to vector<16x16xf32>
    %359 = vector.broadcast %356 : f32 to vector<16x16xf32>
    %360 = arith.mulf %359, %358 : vector<16x16xf32>
    %361 = arith.addf %355, %360 : vector<16x16xf32>
    %c14_57 = arith.constant 14 : index
    %362 = memref.load %arg2[%c14_57] : memref<16xf32, #tpu.memory_space<smem>>
    %363 = vector.extract_strided_slice %1 {offsets = [10, 0, 0], sizes = [1, 16, 16], strides = [1, 1, 1]} : vector<16x16x16xf32> to vector<1x16x16xf32>
    %364 = vector.shape_cast %363 : vector<1x16x16xf32> to vector<16x16xf32>
    %365 = vector.broadcast %362 : f32 to vector<16x16xf32>
    %366 = arith.mulf %365, %364 : vector<16x16xf32>
    %367 = arith.addf %361, %366 : vector<16x16xf32>
    %c15_58 = arith.constant 15 : index
    %368 = memref.load %arg2[%c15_58] : memref<16xf32, #tpu.memory_space<smem>>
    %369 = vector.extract_strided_slice %1 {offsets = [14, 0, 0], sizes = [1, 16, 16], strides = [1, 1, 1]} : vector<16x16x16xf32> to vector<1x16x16xf32>
    %370 = vector.shape_cast %369 : vector<1x16x16xf32> to vector<16x16xf32>
    %371 = vector.broadcast %368 : f32 to vector<16x16xf32>
    %372 = arith.mulf %371, %370 : vector<16x16xf32>
    %373 = arith.addf %367, %372 : vector<16x16xf32>
    %c12_59 = arith.constant 12 : index
    %374 = memref.load %arg2[%c12_59] : memref<16xf32, #tpu.memory_space<smem>>
    %375 = vector.extract_strided_slice %1 {offsets = [3, 0, 0], sizes = [1, 16, 16], strides = [1, 1, 1]} : vector<16x16x16xf32> to vector<1x16x16xf32>
    %376 = vector.shape_cast %375 : vector<1x16x16xf32> to vector<16x16xf32>
    %377 = vector.broadcast %374 : f32 to vector<16x16xf32>
    %378 = arith.mulf %377, %376 : vector<16x16xf32>
    %c13_60 = arith.constant 13 : index
    %379 = memref.load %arg2[%c13_60] : memref<16xf32, #tpu.memory_space<smem>>
    %380 = vector.extract_strided_slice %1 {offsets = [7, 0, 0], sizes = [1, 16, 16], strides = [1, 1, 1]} : vector<16x16x16xf32> to vector<1x16x16xf32>
    %381 = vector.shape_cast %380 : vector<1x16x16xf32> to vector<16x16xf32>
    %382 = vector.broadcast %379 : f32 to vector<16x16xf32>
    %383 = arith.mulf %382, %381 : vector<16x16xf32>
    %384 = arith.addf %378, %383 : vector<16x16xf32>
    %c14_61 = arith.constant 14 : index
    %385 = memref.load %arg2[%c14_61] : memref<16xf32, #tpu.memory_space<smem>>
    %386 = vector.extract_strided_slice %1 {offsets = [11, 0, 0], sizes = [1, 16, 16], strides = [1, 1, 1]} : vector<16x16x16xf32> to vector<1x16x16xf32>
    %387 = vector.shape_cast %386 : vector<1x16x16xf32> to vector<16x16xf32>
    %388 = vector.broadcast %385 : f32 to vector<16x16xf32>
    %389 = arith.mulf %388, %387 : vector<16x16xf32>
    %390 = arith.addf %384, %389 : vector<16x16xf32>
    %c15_62 = arith.constant 15 : index
    %391 = memref.load %arg2[%c15_62] : memref<16xf32, #tpu.memory_space<smem>>
    %392 = vector.extract_strided_slice %1 {offsets = [15, 0, 0], sizes = [1, 16, 16], strides = [1, 1, 1]} : vector<16x16x16xf32> to vector<1x16x16xf32>
    %393 = vector.shape_cast %392 : vector<1x16x16xf32> to vector<16x16xf32>
    %394 = vector.broadcast %391 : f32 to vector<16x16xf32>
    %395 = arith.mulf %394, %393 : vector<16x16xf32>
    %396 = arith.addf %390, %395 : vector<16x16xf32>
    %397 = tpu.concatenate %373, %396 in 1 : vector<16x16xf32>, vector<16x16xf32> -> vector<16x32xf32>
    %cst_63 = arith.constant dense<0.000000e+00> : vector<16x32xf32>
    %398 = tpu.matmul %397, %2, %cst_63 {dimension_numbers = #tpu.dot_dimension_numbers<[1], [0], [0], [1], [0, 0, 1, 1], [], []>} : vector<16x32xf32>, vector<32x32xf32>, vector<16x32xf32> -> vector<16x32xf32>
    %399 = tpu.concatenate %350, %398 in 1 : vector<16x32xf32>, vector<16x32xf32> -> vector<16x64xf32>
    %c3_64 = arith.constant 3 : index
    %400 = memref.load %arg3[%c3_64] : memref<4xf32, #tpu.memory_space<smem>>
    %401 = vector.broadcast %400 : f32 to vector<16x64xf32>
    %402 = arith.addf %399, %401 : vector<16x64xf32>
    %403 = vector.shape_cast %102 : vector<16x64xf32> to vector<1x16x64xf32>
    %404 = vector.shape_cast %202 : vector<16x64xf32> to vector<1x16x64xf32>
    %405 = vector.shape_cast %302 : vector<16x64xf32> to vector<1x16x64xf32>
    %406 = vector.shape_cast %402 : vector<16x64xf32> to vector<1x16x64xf32>
    %407 = tpu.concatenate %403, %404, %405, %406 in 0 : vector<1x16x64xf32>, vector<1x16x64xf32>, vector<1x16x64xf32>, vector<1x16x64xf32> -> vector<4x16x64xf32>
    %c0_65 = arith.constant 0 : index
    %c0_66 = arith.constant 0 : index
    %c0_67 = arith.constant 0 : index
    %c0_68 = arith.constant 0 : index
    %408 = vector.load %arg6[%c0_65, %c0_66, %c0_67, %c0_68] : memref<1x4x16x64xf32, #tpu.memory_space<vmem>>, vector<1x4x16x64xf32>
    %409 = vector.shape_cast %408 : vector<1x4x16x64xf32> to vector<4x16x64xf32>
    %410 = vector.shape_cast %407 : vector<4x16x64xf32> to vector<1x4x16x64xf32>
    tpu.vector_store %arg6[%c0_65, %c0_66, %c0_67, %c0_68], %410 {strides = array<i32>} : memref<1x4x16x64xf32, #tpu.memory_space<vmem>>, vector<1x4x16x64xf32>,
    return
  }
  func.func @transform_0(%arg0: i32, %arg1: i32) -> i32 {
    %c0_i32 = arith.constant 0 : i32
    %c0_i32_0 = arith.constant 0 : i32
    return %c0_i32 : i32
  }
  func.func @transform_1(%arg0: i32, %arg1: i32) -> i32 {
    %c0_i32 = arith.constant 0 : i32
    %c0_i32_0 = arith.constant 0 : i32
    return %c0_i32 : i32
  }
  func.func @transform_2(%arg0: i32, %arg1: i32) -> (i32, i32) {
    %c0_i32 = arith.constant 0 : i32
    %c0_i32_0 = arith.constant 0 : i32
    %c0_i32_1 = arith.constant 0 : i32
    return %c0_i32, %c0_i32_0 : i32, i32
  }
  func.func @transform_3(%arg0: i32, %arg1: i32) -> (i32, i32, i32, i32) {
    %c0_i32 = arith.constant 0 : i32
    %c0_i32_0 = arith.constant 0 : i32
    %c0_i32_1 = arith.constant 0 : i32
    return %arg0, %c0_i32, %arg1, %c0_i32_0 : i32, i32, i32, i32
  }
  func.func @transform_4(%arg0: i32, %arg1: i32) -> (i32, i32, i32, i32) {
    %c0_i32 = arith.constant 0 : i32
    %c0_i32_0 = arith.constant 0 : i32
    %c0_i32_1 = arith.constant 0 : i32
    return %arg0, %c0_i32, %arg1, %c0_i32_0 : i32, i32, i32, i32
  }
}

</mosaic_0001>

<bundles_post_ra>
// kernel: tpu_custom_call.1
= control target key start
LH: loop header
LB: loop body
LE: loop exit
PB: predicated region body
PF: predicated region fallthrough
CT: control target
= control target key end

     0   :  { %9 = vsyncpa [#allocation5], 0  ;;  %s2812_s0 = inlined_call_operand.hbm [shape: f32[16], index: 0, kind: input, shape index: {}]   ;;  %s2813_s1 = inlined_call_operand.vmem [shape: f32[4], index: 1, kind: input, shape index: {}]   ;;  %s2814_s2 = inlined_call_operand.hbm [shape: f32[32,32], index: 2, kind: input, shape index: {}]   ;;  %s2815_s3 = inlined_call_operand.hbm [shape: f32[2,16,16,16], index: 3, kind: input, shape index: {}]   ;;  %s2816_s4 = inlined_call_operand.hbm [shape: f32[2,4,16,64], index: 4, kind: output, shape index: {}]  }
   0x1   :  { %10 = vsyncpa [#allocation6], 0 }
   0x2   :  { %11 = vsyncpa [#allocation3], 0 }
   0x3   :  { %12 = vsyncpa [#allocation10], 0 }
   0x4   :  { %14 = vsyncpa [#allocation10 + $0x1], 0 }
   0x5   :  { %15 = vsyncpa [#allocation4], 0 }
   0x6   :  { %17 = vsyncpa [#allocation4 + $0x1], 0  ;;  %s2004_s15 = smov 0   ;;  %s2006_s16 = smov 0  }
   0x7   :  { %s2008_s17 = smov 0   ;;  %s2010_s18 = smov 0  }
   0x8   :  { %s2012_s19 = smov 0   ;;  %s2014_s20 = smov 0  }
   0x9 LB: > { %s1502_s21 = sadd.s32 4294967295, %s1966_s20   ;;  %s1503_s22 = sadd.s32 4294967294, %s1966_s20   ;;  %s1966_s20 = sphi %s2014_s20, %s23_s20   ;;  %s1962_s19 = sphi %s2012_s19, %s2843_s19   ;;  %s1958_s18 = sphi %s2010_s18, %s2842_s18   ;;  %s1954_s17 = sphi %s2008_s17, %s2841_s17   ;;  %s1950_s16 = sphi %s2006_s16, %s2840_s16   ;;  %s1946_s15 = sphi %s2004_s15, %s2839_s15  }
   0xa   : > { %p120_p0 = scmp.ne.s32.totalorder %s1950_s16, %s1946_s15  ;;  %p2038_p1 = scmp.eq.s32.totalorder %s1502_s21, 0 }
   0xb   : > { %p2042_p2 = scmp.eq.s32.totalorder %s1502_s21, 1  ;;  %p152_p3 = scmp.eq.s32.totalorder %s1503_s22, 1 }
   0xc   : > { %s2823_s23 = scalar_select %p2038_p1, 1, 0 }
   0xd   : > { %s2824_s24 = scalar_select %p2042_p2, 1, 0 }
   0xe   : > { %p2048_p4 = por %p2038_p1, %p120_p0  ;;  %p1504_p5 = scmp.ge.s32.totalorder %s1966_s20, 1 }
   0xf   : > { %p2053_p6 = por %p152_p3, %p120_p0  ;;  %p159_p7 = scmp.lt.s32.totalorder %s1966_s20, 3 }
  0x10   : > { %s2825_s25 = scalar_select %p2048_p4, 1, 0 }
  0x11   : > { %s2826_s26 = scalar_select %p2053_p6, 1, 0 }
  0x12   : > { %p2058_p8 = pnand %p1504_p5, %p159_p7  ;;  %s181_s30 = sshll.u32 %s2813_s1, 4  ;;  %s182_s30 = int_to_ptr.vmem [resolvable:$true] %s181_s30 }
  0x13   : > { %s1968_s6 = smov [#allocation8]   ;;  %s1969_s8 = smov [#allocation2]  }
  0x14   : > { %s2827_s27 = scalar_select %p2058_p8, 1, 0 }
  0x15   : > { %p1711_p10 = pneg %p2058_p8  ;;  %s191_s7 = sshll.u32 %s1968_s6, 4  ;;  %s2074_s7 = int_to_ptr.vmem [resolvable:$true] %s191_s7 }
  0x16   : > { %s1805_s11 = scalar_lea.vmem %s182_s30, 16  ;;  %p1813_p5 = scmp.lt.s32.totalorder %s182_s30, %s182_s30 }
  0x17   : > { %p2070_p11 = pnand %p1711_p10, %p2038_p1  ;;  %p1806_p12 = scmp.ne.s32.totalorder %s182_s30, %s1805_s11 }
  0x18   : > { %p1814_p7 = scmp.lt.s32.totalorder %s1805_s11, %s1805_s11 }
  0x19   : > { %1714 = dma.hbm_to_smem (!%p2070_p11), %s2812_s0, 16, %s1969_s8, [#allocation5]  }
  0x1a   : > { %p1807_p13 = pneg %p2070_p11  ;;  %p1815_p10 = por %p1814_p7, %p1813_p5 }
  0x1c   : > { %p1808_p0 = pnand %p1807_p13, %p1806_p12 }
  0x1e   : > { %p1809_p3 = pneg %p1808_p0 }
  0x20   : > { %p1816_p9 = pnand %p1815_p10, %p1809_p3 }
  0x22   : > { %1819 = shalt.err (!%p1816_p9)
}
  0x23   : > { %s1970_s12 = smov [#allocation7]   ;;  %s1831_s13 = scalar_lea.vmem %s2074_s7, 512 }
  0x24   : > { %1717 = dma.vmem_to_smem (!%p2070_p11), %s182_s30, 16, %s1970_s12, [#allocation6]  }
  0x25   : > { %p1832_p6 = scmp.ne.s32.totalorder %s2074_s7, %s1831_s13  ;;  %p1839_p8 = scmp.lt.s32.totalorder %s2074_s7, %s2074_s7 }
  0x26   : > { %p1840_p12 = scmp.lt.s32.totalorder %s1831_s13, %s1831_s13 }
  0x27   : > { %p1834_p4 = pnand %p1832_p6, %p1807_p13 }
  0x28   : > { %p1841_p0 = por %p1840_p12, %p1839_p8 }
  0x29   : > { %p1835_p1 = pneg %p1834_p4 }
  0x2b   : > { %p1842_p2 = pnand %p1841_p0, %p1835_p1 }
  0x2d   : > { %1845 = shalt.err (!%p1842_p2)
}
  0x2e   : > { %s2821_s14 = smov 128   ;;  %s2822_s21 = smov 8  }
  0x2f   : > { %1720 = dma.hbm_to_vmem [thread:$0]  (!%p2070_p11), %s2814_s2, 512, %s2074_s7, [#allocation3], %s2821_s14, %s2821_s14, %s2822_s21  }
  0x30   : > { %s107_s29 = sadd.s32 1, %s1954_s17  ;;  %s35_s30 = sadd.s32 1, %s1962_s19 }
  0x31   : > { %p114_p1 = scmp.ne.s32.totalorder %s1954_s17, %s1950_s16  ;;  %p37_p2 = scmp.ge.s32.totalorder %s35_s30, 2 }
  0x32   : > { %p115_p4 = scmp.eq.s32.totalorder %s1966_s20, 0  ;;  %p2829_p6 = scmp.ne.s32.totalorder %s2824_s24, 0 }
  0x33   : > { %p1732_p9 = scmp.lt.s32.totalorder %s1966_s20, 2  ;;  %s2845_s30 = smov (%p37_p2, %s35_s30), 0 }
  0x34   : > { %p2105_p8 = por %p2829_p6, %p114_p1  ;;  %p116_p13 = por %p115_p4, %p114_p1 }
  0x35   : > { %s205_s5 = sand.u32 1, %s1954_s17   ;;  %s102_s8 = ssub.s32 %s1962_s19, %s2845_s30 }
  0x36   : > { %p105_p3 = scmp.eq.s32.totalorder %s102_s8, 0  ;;  %s1509_s7 = sshll.u32 %s205_s5, 8 }
  0x37   : > { %s1557_s9 = sshll.u32 %s1962_s19, 12  ;;  %s209_s13 = scalar_lea.vmem [#allocation9], %s1509_s7 }
  0x38   : > { %s2117_s10 = scalar_select %p105_p3, %s1954_s17, %s107_s29  }
  0x39   : > { %s217_s24 = scalar_lea.hbm %s2815_s3, %s1557_s9  ;;  %s218_s22 = sshll.u32 %s209_s13, 4  ;;  %s219_s22 = int_to_ptr.vmem [resolvable:$true] %s218_s22 }
  0x3a   : > { %p2124_p11 = pnand %p1732_p9, %p116_p13  ;;  %s206_s14 = scalar_lea.sflag [#allocation10], %s205_s5 }
  0x3b   : > { %s1859_s8 = scalar_lea.vmem %s219_s22, 4096  ;;  %s1973_s29 = smov [#allocation9]  }
  0x3c   : > { %p1848_p5 = pneg %p2124_p11  ;;  %p1860_p7 = scmp.ne.s32.totalorder %s219_s22, %s1859_s8 }
  0x3d   : > { %s1864_s21 = sshll.u32 %s1973_s29, 4  ;;  %s1865_s21 = int_to_ptr.vmem [resolvable:$false] %s1864_s21 }
  0x3e   : > { %p1862_p10 = pnand %p1860_p7, %p1848_p5  ;;  %s1866_s9 = scalar_lea.vmem %s1865_s21, 8192 }
  0x3f   : > { %p1867_p0 = scmp.lt.s32.totalorder %s219_s22, %s1865_s21  ;;  %p1868_p1 = scmp.lt.s32.totalorder %s1866_s9, %s1859_s8 }
  0x40   : > { %p1863_p12 = pneg %p1862_p10 }
  0x41   : > { %p1869_p2 = por %p1868_p1, %p1867_p0 }
  0x43   : > { %p1870_p4 = pnand %p1869_p2, %p1863_p12 }
  0x45   : > { %1873 = shalt.err (!%p1870_p4)
}
  0x46   : > { %s2832_s7 = smov 8   ;;  %s2833_s11 = smov 128  }
  0x47   : > { %1724 = dma.hbm_to_vmem [thread:$0]  (!%p2124_p11), %s217_s24, 4096, %s219_s22, %s206_s14, %s2833_s11, %s2833_s11, %s2832_s7  }
  0x48   : > { %p2834_p6 = scmp.ne.s32.totalorder %s2827_s27, 0 }
  0x49   : > { %p2835_p9 = scmp.ne.s32.totalorder (!%p2834_p6), %s2823_s23, 0 }
  0x4a   : > { %230 = sbr.rel (%p2834_p6) target bundleno = 577 (0x241), region = 36 }
  0x4f   : > { %1925 = dma.done.wait (%p2835_p9), [#allocation5], 16  }
  0x50   : > { %1927 = vsyncadd (%p2835_p9), [#allocation5], 4294967280 }
  0x51   : > { %1929 = dma.done.wait (%p2835_p9), [#allocation6], 16  }
  0x52   : > { %1931 = vsyncadd (%p2835_p9), [#allocation6], 4294967280 }
  0x53   : > { %1933 = dma.done.wait (%p2835_p9), [#allocation3], 512  }
  0x54   : > { %1935 = vsyncadd (%p2835_p9), [#allocation3], 4294966784  ;;  %s2150_s27 = sand.u32 1, %s1950_s16   ;;  %p2836_p13 = scmp.ne.s32.totalorder %s2825_s25, 0 }
  0x55   : > { %s1516_s14 = sshll.u32 %s2150_s27, 8  ;;  %s245_s21 = scalar_lea.sflag [#allocation10], %s2150_s27 }
  0x56   : > { %s2154_s5 = scalar_lea.vmem [#allocation9], %s1516_s14 }
  0x57   : > { %1937 = dma.done.wait (%p2836_p13), %s245_s21, 4096  }
  0x58   : > { %1939 = vsyncadd (%p2836_p13), %s245_s21, 4294963200 }
  0x59   : > { %253 = sfence }
  0x5a   : > { %s312_s12 = sld [smem:[#allocation2]]  ;;  %v2162_v0 = vld [vmem:[#allocation8 + $0x18] sm:$0xff]  ;;  %v2165_v1 = vld [vmem:[%s2154_s5 + $0x30] sm:$0xff]  ;;  %v2182_v5 = vld [vmem:[#allocation8 + $0x8] sm:$0xff]  ;;  %vm356_vm0 = vcmask 130048   ;;  %vm359_vm1 = vcmask 261120  }
  0x5b   : > { %s1518_s23 = sld [smem:[#allocation2 + $0x1]]  ;;  %v2168_v2 = vld [vmem:[%s2154_s5 + $0x70] sm:$0xff]  ;;  %1618 = vmatprep.subr.mxu1 %v2162_v0  ;;  %1607 = vmatprep.subr.mxu0 %v2162_v0  ;;  %v2177_v4 = vld [vmem:[%s2154_s5 + $0x38] sm:$0xff]  ;;  %v2185_v6 = vld [vmem:[%s2154_s5 + $0x20] sm:$0xff]  ;;  %vm1354_vm2 = vcmask 523264  }
  0x5c   : > { %s2160_s24 = sld [smem:[#allocation2 + $0x2]]  ;;  %v2173_v3 = vld [vmem:[#allocation8 + $0x10] sm:$0xff]  ;;  %1619 = vmatpush3.msra.mxu1 %v2162_v0  ;;  %1608 = vmatpush3.msra.mxu0 %v2162_v0  ;;  %v2192_v8 = vld [vmem:[%s2154_s5 + $0x78] sm:$0xff]  ;;  %v2198_v9 = vld [vmem:[%s2154_s5 + $0x60] sm:$0xff] }
  0x5d   : > { %s2170_s25 = sld [smem:[#allocation2 + $0x3]]  ;;  %v2189_v7 = vld [vmem:[%s2154_s5 + $0xb0] sm:$0xff]  ;;  %1620 = vmatprep.subr.mxu1 %v2173_v3  ;;  %1609 = vmatprep.subr.mxu0 %v2173_v3  ;;  %v2204_v11 = vld [vmem:[%s2154_s5 + $0xb8] sm:$0xff]  ;;  %v2210_v12 = vld [vmem:[%s2154_s5 + $0xa0] sm:$0xff] }
  0x5e   : > { %s2179_s13 = sld [smem:[#allocation2 + $0x4]]  ;;  %1621 = vmatpush3.msra.mxu1 %v2173_v3  ;;  %v2212_v13 = vld [vmem:[#allocation8] sm:$0xff]  ;;  %1610 = vmatpush3.msra.mxu0 %v2173_v3  ;;  %v2216_v14 = vld [vmem:[%s2154_s5 + $0xf0] sm:$0xff]  ;;  %v2223_v17 = vld [vmem:[%s2154_s5 + $0xf8] sm:$0xff] }
  0x5f   : > { %s2194_s22 = sld [smem:[#allocation2 + $0x5]]  ;;  %1622 = vmatprep.subr.mxu1 %v2182_v5  ;;  %1611 = vmatprep.subr.mxu0 %v2182_v5  ;;  %v2244_v23 = vld [vmem:[%s2154_s5 + $0xe0] sm:$0xff] }
  0x60   : > { %v2201_v10 = vstv %s312_s12  ;;  %s2206_s28 = sld [smem:[#allocation2 + $0x6]]  ;;  %1623 = vmatpush3.msra.mxu1 %v2182_v5  ;;  %1612 = vmatpush3.msra.mxu0 %v2182_v5 }
  0x61   : > { %v2218_v15 = vstv %s1518_s23  ;;  %v455_v16 = vmul.f32 %v2201_v10, %v2165_v1  ;;  %v456_v18 = vmul.f32 %v2201_v10, %v2177_v4  ;;  %s2227_s8 = sld [smem:[#allocation2 + $0x7]]  ;;  %v441_v19 = vmul.f32 %v2201_v10, %v2185_v6  ;;  %1624 = vmatprep.subr.mxu1 %v2212_v13  ;;  %1613 = vmatprep.subr.mxu0 %v2212_v13 }
  0x62   : > { %v2234_v20 = vstv %s2160_s24  ;;  %v457_v21 = vmul.f32 %v2218_v15, %v2168_v2  ;;  %v458_v22 = vmul.f32 %v2218_v15, %v2192_v8  ;;  %s2240_s29 = sld [smem:[#allocation2 + $0x8]]  ;;  %v443_v24 = vmul.f32 %v2218_v15, %v2198_v9  ;;  %1625 = vmatpush3.msra.mxu1 %v2212_v13  ;;  %1614 = vmatpush3.msra.mxu0 %v2212_v13  ;;  %s1974_s24 = smov 16  }
  0x63   : > { %v2250_v25 = vstv %s2170_s25  ;;  %v461_v26 = vmul.f32 %v2234_v20, %v2189_v7  ;;  %v462_v27 = vmul.f32 %v2234_v20, %v2204_v11  ;;  %s2256_s9 = sld [smem:[#allocation2 + $0x9]]  ;;  %v2260_v28 = vmul.f32 %v2234_v20, %v2210_v12  ;;  %1640 = vmatprep.subr.mxu1 %v2162_v0  ;;  %1629 = vmatprep.subr.mxu0 %v2162_v0 }
  0x64   : > { %v459_v29 = vadd.f32 %v457_v21, %v455_v16  ;;  %v465_v30 = vmul.f32 %v2250_v25, %v2216_v14  ;;  %v460_v31 = vadd.f32 %v458_v22, %v456_v18  ;;  %v466_v32 = vmul.f32 %v2250_v25, %v2223_v17  ;;  %s2268_s7 = sld [smem:[#allocation2 + $0xa]] }
  0x65   : > { %v2272_v33 = vstv %s2179_s13  ;;  %v2275_v34 = vstv %s2194_s22  ;;  %s2277_s11 = sld [smem:[#allocation2 + $0xb]]  ;;  %v2279_v35 = vadd.f32 %v443_v24, %v441_v19  ;;  %v2283_v36 = vmul.f32 %v2250_v25, %v2244_v23  ;;  %s1517_s13 = sshll.u32 %s2150_s27, 6 }
  0x66   : > { %v463_v37 = vadd.f32 %v461_v26, %v459_v29  ;;  %v464_v38 = vadd.f32 %v462_v27, %v460_v31  ;;  %v2288_v39 = vstv %s2206_s28  ;;  %v715_v40 = vmul.f32 %v2272_v33, %v2165_v1  ;;  %s2292_s14 = sld [smem:[#allocation2 + $0xc]]  ;;  %s2733_s28 = scalar_lea.vmem [#allocation11], %s1517_s13 }
  0x67   : > { %v2296_v41 = vstv %s2227_s8  ;;  %v717_v42 = vmul.f32 %v2275_v34, %v2168_v2  ;;  %v721_v43 = vmul.f32 %v2288_v39, %v2189_v7  ;;  %v716_v44 = vmul.f32 %v2272_v33, %v2177_v4  ;;  %s2304_s21 = sld [smem:[#allocation2 + $0xd]] }
  0x68   : > { %v467_v45 = vadd.f32 %v465_v30, %v463_v37  ;;  %v468_v46 = vadd.f32 %v466_v32, %v464_v38  ;;  %v725_v47 = vmul.f32 %v2296_v41, %v2216_v14  ;;  %v718_v48 = vmul.f32 %v2275_v34, %v2192_v8  ;;  %s2310_s12 = sld [smem:[#allocation2 + $0xe]] }
  0x69   : > { %v719_v49 = vadd.f32 %v717_v42, %v715_v40  ;;  %v722_v50 = vmul.f32 %v2288_v39, %v2204_v11  ;;  %v726_v51 = vmul.f32 %v2296_v41, %v2223_v17  ;;  %v2317_v52 = vstv %s2240_s29  ;;  %s1546_s23 = sld [smem:[#allocation2 + $0xf]] }
  0x6a   : > { %471 = vrot.lane.b32.xlu0 %v467_v45, %s1974_s24  ;;  %v720_v53 = vadd.f32 %v718_v48, %v716_v44  ;;  %v2321_v54 = vstv %s2256_s9  ;;  %v2324_v55 = vstv %s2268_s7  ;;  %v975_v56 = vmul.f32 %v2317_v52, %v2165_v1  ;;  %v2367_v44 = vld [vmem:[%s2154_s5 + $0x10] sm:$0xff]  ;;  %s570_s25 = sld [smem:[#allocation7]]  ;;  %s1558_s9 = sshll.u32 %s1958_s18, 10 }
  0x6b   : > { %v723_v57 = vadd.f32 %v721_v43, %v719_v49  ;;  %v2329_v58 = vstv %s2277_s11  ;;  %v977_v59 = vmul.f32 %v2321_v54, %v2168_v2  ;;  %v981_v60 = vmul.f32 %v2324_v55, %v2189_v7  ;;  %v2370_v45 = vld [vmem:[%s2154_s5 + $0x50] sm:$0xff]  ;;  %s1533_s22 = sld [smem:[#allocation7 + $0x1]]  ;;  %s1379_s7 = sshll.u32 %s2733_s28, 4  ;;  %s2760_s7 = int_to_ptr.vmem [resolvable:$true] %s1379_s7 }
  0x6c   : > { %v724_v61 = vadd.f32 %v722_v50, %v720_v53  ;;  %v985_v62 = vmul.f32 %v2329_v58, %v2216_v14  ;;  %v976_v63 = vmul.f32 %v2317_v52, %v2177_v4  ;;  %v978_v16 = vmul.f32 %v2321_v54, %v2192_v8  ;;  %v2382_v48 = vld [vmem:[%s2154_s5 + $0xd0] sm:$0xff]  ;;  %v2395_v53 = vld [vmem:[%s2154_s5 + $0x98] sm:$0xff]  ;;  %s1542_s8 = sld [smem:[#allocation7 + $0x2]]  ;;  %s1364_s18 = scalar_lea.sflag [#allocation4], %s2150_s27 }
  0x6d   : > { %v727_v18 = vadd.f32 %v725_v47, %v723_v57  ;;  %v979_v19 = vadd.f32 %v977_v59, %v975_v56  ;;  %v982_v21 = vmul.f32 %v2324_v55, %v2204_v11  ;;  %v986_v22 = vmul.f32 %v2329_v58, %v2223_v17  ;;  %s1551_s29 = sld [smem:[#allocation7 + $0x3]] }
  0x6e   : > { %473 = vrot.lane.b32.xlu0 %v468_v46, %s1974_s24  ;;  %v728_v24 = vadd.f32 %v726_v51, %v724_v61  ;;  %v980_v26 = vadd.f32 %v978_v16, %v976_v63  ;;  %v2347_v27 = vstv %s2292_s14  ;;  %v2350_v29 = vstv %s2304_s21  ;;  %v2389_v51 = vld [vmem:[%s2154_s5 + $0x18] sm:$0xff]  ;;  %s2758_s21 = scalar_lea.hbm %s2816_s4, %s1558_s9 }
  0x6f   : > { %731 = vrot.lane.b32.xlu1 %v727_v18, %s1974_s24  ;;  %v983_v30 = vadd.f32 %v981_v60, %v979_v19  ;;  %v2354_v31 = vstv %s2310_s12  ;;  %v2356_v32 = vstv %s1546_s23  ;;  %v1235_v37 = vmul.f32 %v2347_v27, %v2165_v1  ;;  %s1874_s12 = scalar_lea.vmem %s2760_s7, 1024  ;;  %s1976_s23 = smov [#allocation11]  }
  0x70   : > { %v984_v38 = vadd.f32 %v982_v21, %v980_v26  ;;  %v1237_v40 = vmul.f32 %v2350_v29, %v2168_v2  ;;  %v1241_v42 = vmul.f32 %v2354_v31, %v2189_v7  ;;  %v1245_v43 = vmul.f32 %v2356_v32, %v2216_v14  ;;  %v2379_v7 = vld [vmem:[%s2154_s5 + $0x90] sm:$0xff]  ;;  %v2424_v21 = vld [vmem:[%s2154_s5 + $0xe8] sm:$0xff]  ;;  %p1875_p3 = scmp.ne.s32.totalorder %s2760_s7, %s1874_s12 }
  0x71   : > { %v987_v46 = vadd.f32 %v985_v62, %v983_v30  ;;  %v1236_v1 = vmul.f32 %v2347_v27, %v2177_v4  ;;  %v1238_v47 = vmul.f32 %v2350_v29, %v2192_v8  ;;  %v1242_v2 = vmul.f32 %v2354_v31, %v2204_v11  ;;  %v2392_v8 = vld [vmem:[%s2154_s5 + $0x58] sm:$0xff]  ;;  %v2417_v62 = vld [vmem:[%s2154_s5 + $0xa8] sm:$0xff] }
  0x72   : > { %v988_v14 = vadd.f32 %v986_v22, %v984_v38  ;;  %v1239_v49 = vadd.f32 %v1237_v40, %v1235_v37  ;;  %v1246_v50 = vmul.f32 %v2356_v32, %v2223_v17  ;;  %v449_v4 = vadd.f32 %v2260_v28, %v2279_v35  ;;  %v2404_v28 = vld [vmem:[%s2154_s5 + $0xd8] sm:$0xff]  ;;  %v2407_v35 = vld [vmem:[%s2154_s5 + $0x68] sm:$0xff]  ;;  %p1876_p11 = pnand %p1875_p3, %p2105_p8 }
  0x73   : > { %733 = vrot.lane.b32.xlu1 %v728_v24, %s1974_s24  ;;  %991 = vrot.lane.b32.xlu0 %v987_v46, %s1974_s24  ;;  %v1240_v11 = vadd.f32 %v1238_v47, %v1236_v1  ;;  %v334_v17 = vmul.f32 %v2201_v10, %v2367_v44  ;;  %v336_v56 = vmul.f32 %v2218_v15, %v2370_v45 }
  0x74   : > { %v1243_v57 = vadd.f32 %v1241_v42, %v1239_v49  ;;  %v2410_v59 = vadd.f32 %v2283_v36, %v449_v4  ;;  %v340_v60 = vmul.f32 %v2234_v20, %v2379_v7  ;;  %v344_v61 = vmul.f32 %v2250_v25, %v2382_v48  ;;  %v2427_v36 = vld [vmem:[%s2154_s5 + $0x28] sm:$0xff]  ;;  %p1877_p5 = pneg %p1876_p11 }
  0x75   : > { %v1244_v63 = vadd.f32 %v1242_v2, %v1240_v11  ;;  %v338_v16 = vadd.f32 %v336_v56, %v334_v17  ;;  %v335_v18 = vmul.f32 %v2201_v10, %v2389_v51  ;;  %v337_v19 = vmul.f32 %v2218_v15, %v2392_v8 }
  0x76   : > { %v1247_v22 = vadd.f32 %v1245_v43, %v1243_v57  ;;  %v341_v24 = vmul.f32 %v2234_v20, %v2395_v53  ;;  %v345_v26 = vmul.f32 %v2250_v25, %v2404_v28  ;;  %v444_v30 = vmul.f32 %v2218_v15, %v2407_v35 }
  0x77   : > { %993 = vrot.lane.b32.xlu1 %v988_v14, %s1974_s24  ;;  %v1248_v37 = vadd.f32 %v1246_v50, %v1244_v63  ;;  %v342_v38 = vadd.f32 %v340_v60, %v338_v16  ;;  %v339_v40 = vadd.f32 %v337_v19, %v335_v18  ;;  %v448_v42 = vmul.f32 %v2234_v20, %v2417_v62 }
  0x78   : > { %1251 = vrot.lane.b32.xlu0 %v1247_v22, %s1974_s24  ;;  %v452_v43 = vmul.f32 %v2250_v25, %v2424_v21  ;;  %v442_v46 = vmul.f32 %v2201_v10, %v2427_v36  ;;  %v703_v1 = vmul.f32 %v2275_v34, %v2198_v9  ;;  %v707_v47 = vmul.f32 %v2288_v39, %v2210_v12 }
  0x79   : > { %v346_v2 = vadd.f32 %v344_v61, %v342_v38  ;;  %v343_v14 = vadd.f32 %v341_v24, %v339_v40  ;;  %v711_v49 = vmul.f32 %v2296_v41, %v2244_v23  ;;  %v701_v50 = vmul.f32 %v2272_v33, %v2185_v6 }
  0x7a   : > { %v446_v4 = vadd.f32 %v444_v30, %v442_v46  ;;  %v596_v11 = vmul.f32 %v2272_v33, %v2367_v44  ;;  %v598_v17 = vmul.f32 %v2275_v34, %v2370_v45  ;;  %v602_v56 = vmul.f32 %v2288_v39, %v2379_v7 }
  0x7b   : > { %1253 = vrot.lane.b32.xlu1 %v1248_v37, %s1974_s24  ;;  %v347_v57 = vadd.f32 %v345_v26, %v343_v14  ;;  %v705_v60 = vadd.f32 %v703_v1, %v701_v50  ;;  %v606_v61 = vmul.f32 %v2296_v41, %v2382_v48  ;;  %v704_v63 = vmul.f32 %v2275_v34, %v2407_v35 }
  0x7c   : > { %350 = vrot.lane.b32.xlu0 %v346_v2, %s1974_s24  ;;  %v450_v16 = vadd.f32 %v448_v42, %v446_v4  ;;  %v600_v18 = vadd.f32 %v598_v17, %v596_v11  ;;  %v708_v19 = vmul.f32 %v2288_v39, %v2417_v62  ;;  %v712_v22 = vmul.f32 %v2296_v41, %v2424_v21 }
  0x7d   : > { %v709_v24 = vadd.f32 %v707_v47, %v705_v60  ;;  %v702_v26 = vmul.f32 %v2272_v33, %v2427_v36  ;;  %v597_v30 = vmul.f32 %v2272_v33, %v2389_v51  ;;  %v599_v37 = vmul.f32 %v2275_v34, %v2392_v8 }
  0x7e   : > { %v2473_v38 = vadd.f32 %v452_v43, %v450_v16  ;;  %v604_v40 = vadd.f32 %v602_v56, %v600_v18  ;;  %v603_v42 = vmul.f32 %v2288_v39, %v2395_v53  ;;  %v607_v46 = vmul.f32 %v2296_v41, %v2404_v28 }
  0x7f   : > { %352 = vrot.lane.b32.xlu1 %v347_v57, %s1974_s24  ;;  %v2480_v1 = vadd.f32 %v711_v49, %v709_v24  ;;  %v706_v47 = vadd.f32 %v704_v63, %v702_v26  ;;  %v601_v2 = vadd.f32 %v599_v37, %v597_v30  ;;  %v963_v14 = vmul.f32 %v2321_v54, %v2198_v9 }
  0x80   : > { %v608_v50 = vadd.f32 %v606_v61, %v604_v40  ;;  %v967_v43 = vmul.f32 %v2324_v55, %v2210_v12  ;;  %v961_v4 = vmul.f32 %v2317_v52, %v2185_v6  ;;  %v856_v56 = vmul.f32 %v2317_v52, %v2367_v44 }
  0x81   : > { %v710_v11 = vadd.f32 %v708_v19, %v706_v47  ;;  %v605_v17 = vadd.f32 %v603_v42, %v601_v2  ;;  %v858_v49 = vmul.f32 %v2321_v54, %v2370_v45  ;;  %v971_v57 = vmul.f32 %v2329_v58, %v2244_v23 }
  0x82   : > { %612 = vrot.lane.b32.xlu0 %v608_v50, %s1974_s24  ;;  %v965_v60 = vadd.f32 %v963_v14, %v961_v4  ;;  %v862_v61 = vmul.f32 %v2324_v55, %v2379_v7  ;;  %v964_v63 = vmul.f32 %v2321_v54, %v2407_v35  ;;  %v866_v24 = vmul.f32 %v2329_v58, %v2382_v48 }
  0x83   : > { %v2499_v16 = vadd.f32 %v712_v22, %v710_v11  ;;  %v609_v18 = vadd.f32 %v607_v46, %v605_v17  ;;  %v860_v19 = vadd.f32 %v858_v49, %v856_v56  ;;  %v968_v30 = vmul.f32 %v2324_v55, %v2417_v62 }
  0x84   : > { %v969_v26 = vadd.f32 %v967_v43, %v965_v60  ;;  %v962_v37 = vmul.f32 %v2317_v52, %v2427_v36  ;;  %v857_v40 = vmul.f32 %v2317_v52, %v2389_v51  ;;  %v972_v22 = vmul.f32 %v2329_v58, %v2424_v21 }
  0x85   : > { %614 = vrot.lane.b32.xlu1 %v609_v18, %s1974_s24  ;;  %v864_v42 = vadd.f32 %v862_v61, %v860_v19  ;;  %v859_v46 = vmul.f32 %v2321_v54, %v2392_v8  ;;  %v863_v47 = vmul.f32 %v2324_v55, %v2395_v53  ;;  %v1116_v50 = vmul.f32 %v2347_v27, %v2367_v44 }
  0x86   : > { %v2516_v2 = vadd.f32 %v971_v57, %v969_v26  ;;  %v966_v14 = vadd.f32 %v964_v63, %v962_v37  ;;  %v1118_v43 = vmul.f32 %v2350_v29, %v2370_v45  ;;  %v867_v17 = vmul.f32 %v2329_v58, %v2404_v28  ;;  %v2554_v37 = vld [vmem:[%s2154_s5 + $0x8] sm:$0xff] }
  0x87   : > { %v868_v4 = vadd.f32 %v866_v24, %v864_v42  ;;  %v861_v11 = vadd.f32 %v859_v46, %v857_v40  ;;  %v1122_v56 = vmul.f32 %v2354_v31, %v2379_v7  ;;  %v1126_v57 = vmul.f32 %v2356_v32, %v2382_v48  ;;  %v2544_v24 = vld [vmem:[%s2154_s5 + $0x48] sm:$0xff]  ;;  %v276_v40 = vld [vmem:[%s2154_s5] sm:$0xff] }
  0x88   : > { %v970_v49 = vadd.f32 %v968_v30, %v966_v14  ;;  %v1120_v60 = vadd.f32 %v1118_v43, %v1116_v50  ;;  %v1223_v44 = vmul.f32 %v2350_v29, %v2198_v9  ;;  %v1227_v61 = vmul.f32 %v2354_v31, %v2210_v12  ;;  %v2551_v30 = vld [vmem:[%s2154_s5 + $0x88] sm:$0xff]  ;;  %v292_v46 = vld [vmem:[%s2154_s5 + $0x80] sm:$0xff] }
  0x89   : > { %872 = vrot.lane.b32.xlu0 %v868_v4, %s1974_s24  ;;  %v865_v45 = vadd.f32 %v863_v47, %v861_v11  ;;  %v1221_v7 = vmul.f32 %v2347_v27, %v2185_v6  ;;  %v1117_v63 = vmul.f32 %v2347_v27, %v2389_v51  ;;  %v1119_v9 = vmul.f32 %v2350_v29, %v2392_v8  ;;  %v301_v50 = vld [vmem:[%s2154_s5 + $0xc8] sm:$0xff]  ;;  %v300_v11 = vld [vmem:[%s2154_s5 + $0xc0] sm:$0xff] }
  0x8a   : > { %v2537_v18 = vadd.f32 %v972_v22, %v970_v49  ;;  %v1124_v48 = vadd.f32 %v1122_v56, %v1120_v60  ;;  %v1123_v19 = vmul.f32 %v2354_v31, %v2395_v53  ;;  %v1231_v6 = vmul.f32 %v2356_v32, %v2244_v23  ;;  %v284_v23 = vld [vmem:[%s2154_s5 + $0x40] sm:$0xff]  ;;  %s1975_s5 = smov 32  }
  0x8b   : > { %v869_v12 = vadd.f32 %v867_v17, %v865_v45  ;;  %v1225_v26 = vadd.f32 %v1223_v44, %v1221_v7  ;;  %v1224_v51 = vmul.f32 %v2350_v29, %v2407_v35  ;;  %v1121_v42 = vadd.f32 %v1119_v9, %v1117_v63 }
  0x8c   : > { %v1128_v8 = vadd.f32 %v1126_v57, %v1124_v48  ;;  %v1127_v53 = vmul.f32 %v2356_v32, %v2404_v28  ;;  %v1228_v22 = vmul.f32 %v2354_v31, %v2417_v62  ;;  %v1232_v35 = vmul.f32 %v2356_v32, %v2424_v21 }
  0x8d   : > { %874 = vrot.lane.b32.xlu1 %v869_v12, %s1974_s24  ;;  %v1229_v47 = vadd.f32 %v1227_v61, %v1225_v26  ;;  %v1222_v14 = vmul.f32 %v2347_v27, %v2427_v36  ;;  %v319_v43 = vmul.f32 %v2218_v15, %v2544_v24  ;;  %v1125_v28 = vadd.f32 %v1123_v19, %v1121_v42 }
  0x8e   : > { %1132 = vrot.lane.b32.xlu0 %v1128_v8, %s1974_s24  ;;  %v325_v62 = vmul.f32 %v2234_v20, %v2551_v30  ;;  %v315_v4 = vmul.f32 %v2201_v10, %v2554_v37  ;;  %v314_v17 = vmul.f32 %v2201_v10, %v276_v40  ;;  %v318_v36 = vmul.f32 %v2218_v15, %v284_v23 }
  0x8f   : > { %v2578_v21 = vadd.f32 %v1231_v6, %v1229_v47  ;;  %v1226_v56 = vadd.f32 %v1224_v51, %v1222_v14  ;;  %v324_v49 = vmul.f32 %v2234_v20, %v292_v46  ;;  %v1129_v60 = vadd.f32 %v1127_v53, %v1125_v28 }
  0x90   : > { %v331_v57 = vmul.f32 %v2250_v25, %v301_v50  ;;  %v321_v44 = vadd.f32 %v319_v43, %v315_v4  ;;  %v580_v45 = vmul.f32 %v2275_v34, %v284_v23  ;;  %v320_v7 = vadd.f32 %v318_v36, %v314_v17 }
  0x91   : > { %v1230_v61 = vadd.f32 %v1228_v22, %v1226_v56  ;;  %v330_v63 = vmul.f32 %v2250_v25, %v300_v11  ;;  %v586_v48 = vmul.f32 %v2288_v39, %v292_v46  ;;  %1134 = vrot.lane.b32.xlu1 %v1129_v60, %s1974_s24  ;;  %v592_v9 = vmul.f32 %v2296_v41, %v300_v11  ;;  %s1878_s24 = sshll.u32 %s1976_s23, 4  ;;  %s1879_s24 = int_to_ptr.vmem [resolvable:$false] %s1878_s24 }
  0x92   : > { %v327_v10 = vadd.f32 %v325_v62, %v321_v44  ;;  %v576_v15 = vmul.f32 %v2272_v33, %v276_v40  ;;  %v581_v20 = vmul.f32 %v2275_v34, %v2544_v24  ;;  %v326_v12 = vadd.f32 %v324_v49, %v320_v7  ;;  %p1881_p7 = scmp.lt.s32.totalorder %s2760_s7, %s1879_s24 }
  0x93   : > { %v2591_v19 = vadd.f32 %v1232_v35, %v1230_v61  ;;  %v587_v6 = vmul.f32 %v2288_v39, %v2551_v30  ;;  %v577_v25 = vmul.f32 %v2272_v33, %v2554_v37  ;;  %v593_v8 = vmul.f32 %v2296_v41, %v301_v50 }
  0x94   : > { %v2597_v26 = vadd.f32 %v331_v57, %v327_v10  ;;  %v582_v51 = vadd.f32 %v580_v45, %v576_v15  ;;  %v840_v42 = vmul.f32 %v2321_v54, %v284_v23  ;;  %v2601_v53 = vadd.f32 %v330_v63, %v326_v12 }
  0x95   : > { %v583_v22 = vadd.f32 %v581_v20, %v577_v25  ;;  %v846_v34 = vmul.f32 %v2324_v55, %v292_v46  ;;  %v836_v47 = vmul.f32 %v2317_v52, %v276_v40  ;;  %v852_v39 = vmul.f32 %v2329_v58, %v300_v11 }
  0x96   : > { %v588_v35 = vadd.f32 %v586_v48, %v582_v51  ;;  %v841_v33 = vmul.f32 %v2321_v54, %v2544_v24  ;;  %v847_v14 = vmul.f32 %v2324_v55, %v2551_v30  ;;  %v837_v28 = vmul.f32 %v2317_v52, %v2554_v37 }
  0x97   : > { %v589_v43 = vadd.f32 %v587_v6, %v583_v22  ;;  %v842_v41 = vadd.f32 %v840_v42, %v836_v47  ;;  %v1100_v62 = vmul.f32 %v2350_v29, %v284_v23  ;;  %v853_v17 = vmul.f32 %v2329_v58, %v301_v50 }
  0x98   : > { %v2613_v4 = vadd.f32 %v592_v9, %v588_v35  ;;  %v1106_v56 = vmul.f32 %v2354_v31, %v292_v46  ;;  %v1096_v36 = vmul.f32 %v2347_v27, %v276_v40  ;;  %v843_v60 = vadd.f32 %v841_v33, %v837_v28 }
  0x99   : > { %v2618_v49 = vadd.f32 %v593_v8, %v589_v43  ;;  %v848_v54 = vadd.f32 %v846_v34, %v842_v41  ;;  %v1101_v55 = vmul.f32 %v2350_v29, %v2544_v24  ;;  %v1112_v57 = vmul.f32 %v2356_v32, %v300_v11 }
  0x9a   : > { %v1102_v52 = vadd.f32 %v1100_v62, %v1096_v36  ;;  %v1107_v23 = vmul.f32 %v2354_v31, %v2551_v30  ;;  %v1097_v58 = vmul.f32 %v2347_v27, %v2554_v37  ;;  %v849_v46 = vadd.f32 %v847_v14, %v843_v60 }
  0x9b   : > { %v2627_v44 = vadd.f32 %v852_v39, %v848_v54  ;;  %v1113_v45 = vmul.f32 %v2356_v32, %v301_v50  ;;  %v571_v28 = vstv %s570_s25 }
  0x9c   : > { %v1108_v40 = vadd.f32 %v1106_v56, %v1102_v52  ;;  %v1103_v61 = vadd.f32 %v1101_v55, %v1097_v58  ;;  %v2630_v7 = vadd.f32 %v853_v17, %v849_v46  ;;  %v831_v55 = vstv %s1533_s22 }
  0x9e   : > { %v2632_v63 = vadd.f32 %v1112_v57, %v1108_v40  ;;  %v1109_v29 = vadd.f32 %v1107_v23, %v1103_v61  ;;  %v1091_v61 = vstv %s1542_s8 }
  0xa0   : > { %v2634_v24 = vadd.f32 %v1113_v45, %v1109_v29 }
  0xdc   : > { %v472_v31 = vpop.permute.xlu0 %471 }
  0xdd   : > { %v477_v27 = vsel %vm356_vm0, %v2410_v59, %v472_v31 }
  0xde   : > { %1626 = vmatprep.mubr.msk.f32.mxu1 %vm359_vm1, %v477_v27 }
  0xe0   : > { %v474_v30 = vpop.permute.xlu0 %473 }
  0xe1   : > { %v478_v32 = vsel %vm356_vm0, %v2473_v38, %v474_v30  ;;  %v732_v37 = vpop.permute.xlu1 %731 }
  0xe2   : > { %1627 = vmatmul.mubr.msk.f32.vlgmr.msra.gmra.mxu1 %vm359_vm1, %v478_v32  ;;  %v737_v50 = vsel %vm356_vm0, %v2480_v1, %v732_v37  ;;  %v1351_v37 = vstv %s1551_s29 }
  0xe3   : > { %1641 = vmatpush3.msra.mxu1 %v2162_v0  ;;  %1648 = vmatprep.mubr.msk.f32.mxu1 %vm359_vm1, %v737_v50 }
  0xe4   : > { %1642 = vmatprep.subr.mxu1 %v2173_v3 }
  0xe5   : > { %1643 = vmatpush3.msra.mxu1 %v2173_v3  ;;  %v734_v59 = vpop.permute.xlu1 %733  ;;  %v992_v11 = vpop.permute.xlu0 %991 }
  0xe6   : > { %1644 = vmatprep.subr.mxu1 %v2182_v5  ;;  %v738_v38 = vsel %vm356_vm0, %v2499_v16, %v734_v59  ;;  %v997_v1 = vsel %vm356_vm0, %v2516_v2, %v992_v11 }
  0xe7   : > { %1645 = vmatpush3.msra.mxu1 %v2182_v5 }
  0xe8   : > { %1646 = vmatprep.subr.mxu1 %v2212_v13 }
  0xe9   : > { %1647 = vmatpush3.msra.mxu1 %v2212_v13  ;;  %v994_v48 = vpop.permute.xlu1 %993 }
  0xea   : > { %1649 = vmatmul.mubr.msk.f32.vlgmr.msra.gmra.mxu1 %vm359_vm1, %v738_v38  ;;  %1662 = vmatprep.subr.mxu1 %v2162_v0  ;;  %v1252_v10 = vpop.permute.xlu0 %1251  ;;  %v998_v9 = vsel %vm356_vm0, %v2537_v18, %v994_v48 }
  0xeb   : > { %1663 = vmatpush3.msra.mxu1 %v2162_v0  ;;  %1670 = vmatprep.mubr.msk.f32.mxu1 %vm359_vm1, %v997_v1  ;;  %v1257_v20 = vsel %vm356_vm0, %v2578_v21, %v1252_v10 }
  0xec   : > { %1664 = vmatprep.subr.mxu1 %v2173_v3 }
  0xed   : > { %1665 = vmatpush3.msra.mxu1 %v2173_v3  ;;  %v1254_v16 = vpop.permute.xlu1 %1253 }
  0xee   : > { %1666 = vmatprep.subr.mxu1 %v2182_v5  ;;  %v351_v2 = vpop.permute.xlu0 %350  ;;  %v1258_v6 = vsel %vm356_vm0, %v2591_v19, %v1254_v16 }
  0xef   : > { %1667 = vmatpush3.msra.mxu1 %v2182_v5  ;;  %v357_v15 = vsel %vm356_vm0, %v2601_v53, %v351_v2 }
  0xf0   : > { %1668 = vmatprep.subr.mxu1 %v2212_v13  ;;  %1615 = vmatprep.mubr.msk.f32.mxu0 %vm359_vm1, %v357_v15 }
  0xf1   : > { %1669 = vmatpush3.msra.mxu1 %v2212_v13  ;;  %v353_v12 = vpop.permute.xlu1 %352 }
  0xf2   : > { %1671 = vmatmul.mubr.msk.f32.vlgmr.msra.gmra.mxu1 %vm359_vm1, %v998_v9  ;;  %1684 = vmatprep.subr.mxu1 %v2162_v0  ;;  %v358_v18 = vsel %vm356_vm0, %v2597_v26, %v353_v12 }
  0xf3   : > { %1685 = vmatpush3.msra.mxu1 %v2162_v0  ;;  %1692 = vmatprep.mubr.msk.f32.mxu1 %vm359_vm1, %v1257_v20 }
  0xf4   : > { %1686 = vmatprep.subr.mxu1 %v2173_v3  ;;  %1616 = vmatmul.mubr.msk.f32.vlgmr.msra.gmra.mxu0 %vm359_vm1, %v358_v18  ;;  %v613_v21 = vpop.permute.xlu0 %612 }
  0xf5   : > { %1687 = vmatpush3.msra.mxu1 %v2173_v3  ;;  %1630 = vmatpush3.msra.mxu0 %v2162_v0  ;;  %v618_v26 = vsel %vm356_vm0, %v2613_v4, %v613_v21 }
  0xf6   : > { %1688 = vmatprep.subr.mxu1 %v2182_v5  ;;  %1631 = vmatprep.subr.mxu0 %v2173_v3 }
  0xf7   : > { %1689 = vmatpush3.msra.mxu1 %v2182_v5  ;;  %1632 = vmatpush3.msra.mxu0 %v2173_v3  ;;  %v615_v25 = vpop.permute.xlu1 %614 }
  0xf8   : > { %1690 = vmatprep.subr.mxu1 %v2212_v13  ;;  %1633 = vmatprep.subr.mxu0 %v2182_v5  ;;  %v619_v51 = vsel %vm356_vm0, %v2618_v49, %v615_v25 }
  0xf9   : > { %1691 = vmatpush3.msra.mxu1 %v2212_v13  ;;  %1634 = vmatpush3.msra.mxu0 %v2182_v5 }
  0xfa   : > { %1693 = vmatmul.mubr.msk.f32.vlgmr.msra.gmra.mxu1 %vm359_vm1, %v1258_v6  ;;  %1635 = vmatprep.subr.mxu0 %v2212_v13 }
  0xfb   : > { %1636 = vmatpush3.msra.mxu0 %v2212_v13  ;;  %1637 = vmatprep.mubr.msk.f32.mxu0 %vm359_vm1, %v618_v26  ;;  %v873_v19 = vpop.permute.xlu0 %872 }
  0xfc   : > { %1651 = vmatprep.subr.mxu0 %v2162_v0  ;;  %1638 = vmatmul.mubr.msk.f32.vlgmr.msra.gmra.mxu0 %vm359_vm1, %v619_v51  ;;  %v878_v8 = vsel %vm356_vm0, %v2627_v44, %v873_v19 }
  0xfd   : > { %1652 = vmatpush3.msra.mxu0 %v2162_v0  ;;  %1659 = vmatprep.mubr.msk.f32.mxu0 %vm359_vm1, %v878_v8 }
  0xfe   : > { %1653 = vmatprep.subr.mxu0 %v2173_v3 }
  0xff   : > { %1654 = vmatpush3.msra.mxu0 %v2173_v3  ;;  %v875_v42 = vpop.permute.xlu1 %874 }
 0x100   : > { %1655 = vmatprep.subr.mxu0 %v2182_v5  ;;  %v1133_v53 = vpop.permute.xlu0 %1132  ;;  %v879_v22 = vsel %vm356_vm0, %v2630_v7, %v875_v42 }
 0x101   : > { %1656 = vmatpush3.msra.mxu0 %v2182_v5  ;;  %v1138_v34 = vsel %vm356_vm0, %v2632_v63, %v1133_v53 }
 0x102   : > { %1657 = vmatprep.subr.mxu0 %v2212_v13 }
 0x103   : > { %1658 = vmatpush3.msra.mxu0 %v2212_v13  ;;  %v1135_v47 = vpop.permute.xlu1 %1134 }
 0x104   : > { %1673 = vmatprep.subr.mxu0 %v2162_v0  ;;  %1660 = vmatmul.mubr.msk.f32.vlgmr.msra.gmra.mxu0 %vm359_vm1, %v879_v22  ;;  %v1139_v35 = vsel %vm356_vm0, %v2634_v24, %v1135_v47 }
 0x105   : > { %1674 = vmatpush3.msra.mxu0 %v2162_v0  ;;  %1681 = vmatprep.mubr.msk.f32.mxu0 %vm359_vm1, %v1138_v34 }
 0x106   : > { %1675 = vmatprep.subr.mxu0 %v2173_v3 }
 0x107   : > { %1676 = vmatpush3.msra.mxu0 %v2173_v3 }
 0x108   : > { %1677 = vmatprep.subr.mxu0 %v2182_v5 }
 0x109   : > { %1678 = vmatpush3.msra.mxu0 %v2182_v5 }
 0x10a   : > { %1679 = vmatprep.subr.mxu0 %v2212_v13 }
 0x10b   : > { %1680 = vmatpush3.msra.mxu0 %v2212_v13 }
 0x10c   : > { %1682 = vmatmul.mubr.msk.f32.vlgmr.msra.gmra.mxu0 %vm359_vm1, %v1139_v35 }
 0x1a2   : > { %v1628_v0 = vpop.f32.mrf.mxu1 }
 0x1a3   : > { %564 = vrot.lane.b32.xlu1 %v1628_v0, %s1975_s5 }
 0x1a4   : > { %v551_v39 = vpop.f32.mrf.mxu1 }
 0x1a5   : > { %562 = vrot.lane.b32.xlu0 %v551_v39, %s1975_s5 }
 0x1aa   : > { %v1650_v3 = vpop.f32.mrf.mxu1 }
 0x1ab   : > { %824 = vrot.lane.b32.xlu1 %v1650_v3, %s1975_s5 }
 0x1ac   : > { %v811_v33 = vpop.f32.mrf.mxu1 }
 0x1ad   : > { %822 = vrot.lane.b32.xlu0 %v811_v33, %s1975_s5 }
 0x1b2   : > { %v1672_v5 = vpop.f32.mrf.mxu1 }
 0x1b3   : > { %1084 = vrot.lane.b32.xlu1 %v1672_v5, %s1975_s5 }
 0x1b4   : > { %v1071_v14 = vpop.f32.mrf.mxu1  ;;  %v1617_v13 = vpop.f32.mrf.mxu0 }
 0x1b5   : > { %1082 = vrot.lane.b32.xlu0 %v1071_v14, %s1975_s5 }
 0x1b6   : > { %v432_v56 = vpop.f32.mrf.mxu0 }
 0x1ba   : > { %v1694_v43 = vpop.f32.mrf.mxu1 }
 0x1bb   : > { %1344 = vrot.lane.b32.xlu1 %v1694_v43, %s1975_s5 }
 0x1bc   : > { %v1331_v41 = vpop.f32.mrf.mxu1  ;;  %v1639_v60 = vpop.f32.mrf.mxu0 }
 0x1bd   : > { %1342 = vrot.lane.b32.xlu0 %v1331_v41, %s1975_s5  ;;  %s1880_s5 = scalar_lea.vmem %s1879_s24, 2048 }
 0x1be   : > { %v692_v52 = vpop.f32.mrf.mxu0  ;;  %p1882_p10 = scmp.lt.s32.totalorder %s1880_s5, %s1874_s12 }
 0x1c0   : > { %p1883_p12 = por %p1882_p10, %p1881_p7 }
 0x1c2   : > { %p1884_p0 = pnand %p1883_p12, %p1877_p5 }
 0x1c4   : > { %v1661_v45 = vpop.f32.mrf.mxu0 }
 0x1c6   : > { %v952_v63 = vpop.f32.mrf.mxu0 }
 0x1cc   : > { %v1683_v32 = vpop.f32.mrf.mxu0 }
 0x1ce   : > { %v1212_v38 = vpop.f32.mrf.mxu0 }
 0x215   : > { %v565_v62 = vpop.permute.xlu1 %564 }
 0x216   : > { %v569_v4 = vsel %vm359_vm1, %v1617_v13, %v565_v62 }
 0x217   : > { %v573_v17 = vadd.f32 %v571_v28, %v569_v4  ;;  %v563_v36 = vpop.permute.xlu0 %562 }
 0x218   : > { %v568_v49 = vsel %vm359_vm1, %v432_v56, %v563_v36 }
 0x219   : > { %1356 = vst.msk [vmem:[%s2733_s28 + $0x8] sm:$0xff] %vm1354_vm2, %v573_v17  ;;  %v572_v54 = vadd.f32 %v571_v28, %v568_v49 }
 0x21b   : > { %1355 = vst.msk [vmem:[%s2733_s28] sm:$0xff] %vm1354_vm2, %v572_v54 }
 0x21d   : > { %v825_v57 = vpop.permute.xlu1 %824 }
 0x21e   : > { %v829_v23 = vsel %vm359_vm1, %v1639_v60, %v825_v57 }
 0x21f   : > { %v833_v58 = vadd.f32 %v831_v55, %v829_v23  ;;  %v823_v44 = vpop.permute.xlu0 %822 }
 0x220   : > { %v828_v46 = vsel %vm359_vm1, %v692_v52, %v823_v44 }
 0x221   : > { %1358 = vst.msk [vmem:[%s2733_s28 + $0x18] sm:$0xff] %vm1354_vm2, %v833_v58  ;;  %v832_v40 = vadd.f32 %v831_v55, %v828_v46 }
 0x223   : > { %1357 = vst.msk [vmem:[%s2733_s28 + $0x10] sm:$0xff] %vm1354_vm2, %v832_v40 }
 0x225   : > { %v1085_v7 = vpop.permute.xlu1 %1084 }
 0x226   : > { %v1089_v29 = vsel %vm359_vm1, %v1661_v45, %v1085_v7 }
 0x227   : > { %v1093_v24 = vadd.f32 %v1091_v61, %v1089_v29  ;;  %v1083_v31 = vpop.permute.xlu0 %1082 }
 0x228   : > { %v1088_v27 = vsel %vm359_vm1, %v952_v63, %v1083_v31 }
 0x229   : > { %1360 = vst.msk [vmem:[%s2733_s28 + $0x28] sm:$0xff] %vm1354_vm2, %v1093_v24  ;;  %v1092_v30 = vadd.f32 %v1091_v61, %v1088_v27 }
 0x22b   : > { %1359 = vst.msk [vmem:[%s2733_s28 + $0x20] sm:$0xff] %vm1354_vm2, %v1092_v30 }
 0x22d   : > { %v1345_v50 = vpop.permute.xlu1 %1344 }
 0x22e   : > { %v1349_v59 = vsel %vm359_vm1, %v1683_v32, %v1345_v50 }
 0x22f   : > { %v1353_v11 = vadd.f32 %v1351_v37, %v1349_v59  ;;  %v1343_v1 = vpop.permute.xlu0 %1342 }
 0x230   : > { %v1348_v48 = vsel %vm359_vm1, %v1212_v38, %v1343_v1 }
 0x231   : > { %1362 = vst.msk [vmem:[%s2733_s28 + $0x38] sm:$0xff] %vm1354_vm2, %v1353_v11  ;;  %v1352_v10 = vadd.f32 %v1351_v37, %v1348_v48 }
 0x233   : > { %1361 = vst.msk [vmem:[%s2733_s28 + $0x30] sm:$0xff] %vm1354_vm2, %v1352_v10 }
 0x234   : > { %1887 = shalt.err (!%p1884_p0)
}
 0x235   : > { %s1888_s25 = scalar_lea.hbm %s2758_s21, 1024  ;;  %s1892_s28 = scalar_lea.hbm %s2816_s4, 2048 }
 0x236   : > { %p1889_p1 = scmp.ne.s32.totalorder %s2758_s21, %s1888_s25  ;;  %p1893_p6 = scmp.lt.s32.totalorder %s2758_s21, %s2816_s4 }
 0x237   : > { %p1894_p9 = scmp.lt.s32.totalorder %s1892_s28, %s1888_s25 }
 0x238   : > { %p1890_p2 = pnand %p1889_p1, %p2105_p8 }
 0x239   : > { %p1895_p13 = por %p1894_p9, %p1893_p6 }
 0x23a   : > { %p1891_p4 = pneg %p1890_p2 }
 0x23c   : > { %p1896_p3 = pnand %p1895_p13, %p1891_p4 }
 0x23e   : > { %1899 = shalt.err (!%p1896_p3)
}
 0x23f   : > { %s1977_s9 = smov 128   ;;  %s1978_s11 = smov 8  }
 0x240   : > { %1709 = dma.vmem_to_hbm [thread:$0]  (%p2105_p8), %s2760_s7, 1024, %s2758_s21, %s1364_s18, %s1977_s9, %s1977_s9, %s1978_s11  }
 0x241 PF: > { %s1394_s14 = sand.u32 1, %s1946_s15   ;;  %p2837_p11 = scmp.ne.s32.totalorder %s2826_s26, 0 }
 0x242   : > { %p2838_p5 = scmp.ge.s32.totalorder %s1966_s20, 2  ;;  %s1395_s12 = scalar_lea.sflag [#allocation4], %s1394_s14 }
 0x244   : > { %p1726_p7 = pnand %p2838_p5, %p2837_p11 }
 0x246   : > { %p1727_p10 = pneg %p1726_p7 }
 0x248   : > { %1941 = dma.done.wait (%p1727_p10), %s1395_s12, 1024  }
 0x249   : > { %1943 = vsyncadd (%p1727_p10), %s1395_s12, 4294966272  ;;  %s23_s20 = sadd.s32 1, %s1966_s20   ;;  %s2839_s15 = smov %s1950_s16 }
 0x24a   : > { %p20_p12 = scmp.ge.s32.totalorder %s23_s20, 4   ;;  %s2840_s16 = smov %s1954_s17 }
 0x24b   : > { %s2841_s17 = smov %s2117_s10  ;;  %s2842_s18 = smov %s1962_s19 }
 0x24c   : > { %s2843_s19 = smov %s2845_s30  ;;  %22 = sbr.rel (!%p20_p12) target bundleno = 9 (0x9), region = 96 }
 0x251   :  { %1400 = vsyncpa [#allocation3], 1 }
 0x252   :  { %1402 = vsyncpa [#allocation3 + $0x1], 1 }
 0x253   :  { %1403 = vsyncpa [#allocation10], 1 }
 0x254   :  { %1405 = vsyncpa [#allocation10 + $0x1], 1 }
 0x255   :  { %1406 = vsyncpa [#allocation4], 1 }
 0x256   :  { %1408 = vsyncpa [#allocation4 + $0x1], 1 }
 0x257   :  { %1409 = vsyncpa [#allocation5], 1 }
 0x258   :  { %1411 = vsyncpa [#allocation5 + $0x1], 1 }
 0x259   :  { %1412 = vsyncpa [#allocation6], 1 }
 0x25a   :  { %1414 = vsyncpa [#allocation6 + $0x1], 1 }

</bundles_post_ra>
